<compile_context>
chip_gen: v7x
topology: tpu7x:2x2x1
jax: 0.10.0
libtpu: 0.0.40
codegen_flags: <defaults>
</compile_context>

<pallas_src>
import functools

import jax
import jax.numpy as jnp
from jax.experimental import pallas as pl
from jax.experimental.pallas import tpu as pltpu

KSIZE = 5
PAD = 2          # padding(5, (1, 1)) -> ZeroPad2d([2, 2, 2, 2])
LANE = 128

_COMPILER_PARAMS = pltpu.CompilerParams(
    dimension_semantics=("parallel",),       # megacore split on v7x
    vmem_limit_bytes=32 * 1024 * 1024,       # >= v5e default, <= v7x physical
)


def _round_up(x, m):
    return (x + m - 1) // m * m


# ----------------------------------------------------------------------------
# Pallas kernel: fused conv matmul (+ optional in-kernel kh-tap accumulation)
#                + BatchNorm affine + PReLU, bf16 writeback
# ----------------------------------------------------------------------------
def _conv_bn_prelu_kernel(x_ref, w_ref, scale_ref, bias_ref, alpha_ref, o_ref,
                          *, n_taps, row_shift):
    # x_ref:     (M_in, K)       bf16  width-im2col'd input rows
    # w_ref:     (n_taps, K, C)  bf16  one weight matrix per row tap
    # scale_ref: (1, C)          f32   gamma / sqrt(running_var + eps)
    # bias_ref:  (1, C)          f32   (conv_bias - mean) * scale + beta
    # alpha_ref: (1, 1)          f32   PReLU shared slope (SMEM scalar)
    # o_ref:     (M_out, C)      bf16
    #
    # n_taps == 1: plain tiled matmul (full-im2col path, stride-2 layers).
    # n_taps == 5: output row r consumes input rows r + kh*row_shift, kh=0..4
    #              (row_shift = 8-aligned padded output width), accumulated in
    #              f32 without any extra HBM traffic.
    m_out = o_ref.shape[-2]
    acc = jnp.zeros(o_ref.shape, jnp.float32)
    for t in range(n_taps):
        if n_taps == 1:
            xs = x_ref[...]
        else:
            xs = x_ref[pl.ds(t * row_shift, m_out), :]
        acc = acc + jnp.dot(xs, w_ref[t], preferred_element_type=jnp.float32)
    y = acc * scale_ref[...] + bias_ref[...]          # fused BatchNorm (eval)
    alpha = alpha_ref[0, 0]
    o_ref[...] = jnp.where(y > 0, y, alpha * y).astype(o_ref.dtype)   # PReLU


# ----------------------------------------------------------------------------
# Glue: parameter folding, im2col helpers, tiling policy
# ----------------------------------------------------------------------------
def _fold_bn(p, eps):
    scale = p["gamma"] / jnp.sqrt(p["var"] + eps)
    bias = (p["b"] - p["mean"]) * scale + p["beta"]
    return (scale.reshape(1, -1).astype(jnp.float32),
            bias.reshape(1, -1).astype(jnp.float32))


def _choose_m_tiling(M):
    """Pad M to a small quantum (not to tile_m) and pick a 256-1024 row tile,
    preferring >= 2 grid steps so v7x's second TensorCore gets work."""
    if M <= 256:
        Mp = _round_up(M, 8)
        return Mp, Mp
    Mp = _round_up(M, 256)
    for t in (1024, 512, 256):
        if Mp % t == 0 and Mp // t >= 2:
            return Mp, t
    return Mp, 256


def _im2col(x_nhwc, stride):
    """ZeroPad2d([2,2,2,2]) + 5x5 patch extraction (static slicing only)."""
    N, H, W, C = x_nhwc.shape
    xp = jnp.pad(x_nhwc, ((0, 0), (PAD, PAD), (PAD, PAD), (0, 0)))
    Hp, Wp = H + 2 * PAD, W + 2 * PAD
    Ho = (Hp - KSIZE) // stride + 1
    Wo = (Wp - KSIZE) // stride + 1
    cols = []
    for kh in range(KSIZE):
        for kw in range(KSIZE):
            cols.append(
                xp[:, kh: kh + (Ho - 1) * stride + 1: stride,
                      kw: kw + (Wo - 1) * stride + 1: stride, :])
    p = jnp.concatenate(cols, axis=-1)     # feature order = (kh, kw, c)
    return p.reshape(N * Ho * Wo, KSIZE * KSIZE * C), (N, Ho, Wo)


# ----------------------------------------------------------------------------
# Layer drivers
# ----------------------------------------------------------------------------
def _layer_im2col(x_nhwc, p, eps):
    """Stride-2 layers: full im2col in XLA (small tensors) + tiled matmul."""
    cout = p["w"].shape[0]
    patches, (N, Ho, Wo) = _im2col(x_nhwc.astype(jnp.bfloat16), p["stride"])
    M, K = patches.shape

    Kp = _round_up(K, LANE)                      # lane-dense, unmasked loads
    Mp, tile_m = _choose_m_tiling(M)
    patches_p = jnp.pad(patches, ((0, Mp - M), (0, Kp - K)))

    # (C_out, C_in, KH, KW) -> (KH, KW, C_in, C_out) -> (25*C_in, C_out)
    w_mat = jnp.transpose(p["w"], (2, 3, 1, 0)).reshape(K, cout)
    w_p = jnp.pad(w_mat.astype(jnp.bfloat16), ((0, Kp - K), (0, 0)))[None]

    scale, bias = _fold_bn(p, eps)
    alpha = jnp.full((1, 1), p["alpha"], jnp.float32)

    kernel = functools.partial(_conv_bn_prelu_kernel, n_taps=1, row_shift=0)
    cost = pl.CostEstimate(
        flops=2 * Mp * Kp * cout, transcendentals=0,
        bytes_accessed=Mp * Kp * 2 + Kp * cout * 2 + Mp * cout * 2
        + 2 * cout * 4 + 4)
    out = pl.pallas_call(
        kernel,
        out_shape=jax.ShapeDtypeStruct((Mp, cout), jnp.bfloat16),
        grid=(Mp // tile_m,),
        in_specs=[
            pl.BlockSpec((tile_m, Kp), lambda i: (i, 0)),       # patches tile
            pl.BlockSpec((1, Kp, cout), lambda i: (0, 0, 0)),   # weights
            pl.BlockSpec((1, cout), lambda i: (0, 0)),          # BN scale
            pl.BlockSpec((1, cout), lambda i: (0, 0)),          # BN bias
            pl.BlockSpec(memory_space=pltpu.MemorySpace.SMEM),  # PReLU slope
        ],
        out_specs=pl.BlockSpec((tile_m, cout), lambda i: (i, 0)),
        compiler_params=_COMPILER_PARAMS,
        cost_estimate=cost,
    )(patches_p, w_p, scale, bias, alpha)
    return out[:M].reshape(N, Ho, Wo, cout)


def _layer_taps(x_nhwc, p, eps):
    """Stride-1 layers: width-only (5x) im2col in XLA; the 5 kh row taps are
    accumulated in-kernel from the VMEM-resident slab (no 25x HBM patches)."""
    cout, cin = p["w"].shape[0], p["w"].shape[1]
    N, H, W, C = x_nhwc.shape
    xp = jnp.pad(x_nhwc.astype(jnp.bfloat16),
                 ((0, 0), (PAD, PAD), (PAD, PAD), (0, 0)))
    Hp = H + 2 * PAD
    Ho, Wo = H, W                                # 5x5, pad 2, stride 1
    # width-only im2col: feature order (kw, c) -> (N, Hp, Wo, 5*C)
    xw = jnp.concatenate(
        [xp[:, :, kw:kw + Wo, :] for kw in range(KSIZE)], axis=-1)
    # Pad the output-width axis to a multiple of 8 so in-kernel tap offsets
    # (kh * Wo8) stay sublane-aligned; padded columns are sliced off after.
    Wo8 = _round_up(Wo, 8)
    if Wo8 != Wo:
        xw = jnp.pad(xw, ((0, 0), (0, 0), (0, Wo8 - Wo), (0, 0)))
    K1 = KSIZE * C
    xw2 = xw.reshape(N, Hp * Wo8, K1)            # rows ordered (h, wo)
    Mo = Ho * Wo8

    # (C_out, C_in, KH, KW) -> (KH, KW*C_in, C_out): one matrix per row tap
    w_t = jnp.transpose(p["w"], (2, 3, 1, 0)).reshape(KSIZE, K1, cout)
    w_t = w_t.astype(jnp.bfloat16)

    scale, bias = _fold_bn(p, eps)
    alpha = jnp.full((1, 1), p["alpha"], jnp.float32)

    kernel = functools.partial(_conv_bn_prelu_kernel,
                               n_taps=KSIZE, row_shift=Wo8)
    cost = pl.CostEstimate(
        flops=2 * N * Mo * KSIZE * K1 * cout, transcendentals=0,
        bytes_accessed=(N * Hp * Wo8 * K1 * 2 + KSIZE * K1 * cout * 2
                        + N * Mo * cout * 2 + 2 * cout * 4 + 4))
    out = pl.pallas_call(
        kernel,
        out_shape=jax.ShapeDtypeStruct((N, Mo, cout), jnp.bfloat16),
        grid=(N,),
        in_specs=[
            pl.BlockSpec((None, Hp * Wo8, K1), lambda n: (n, 0, 0)),  # slab
            pl.BlockSpec((KSIZE, K1, cout), lambda n: (0, 0, 0)),     # weights
            pl.BlockSpec((1, cout), lambda n: (0, 0)),                # BN scale
            pl.BlockSpec((1, cout), lambda n: (0, 0)),                # BN bias
            pl.BlockSpec(memory_space=pltpu.MemorySpace.SMEM),        # slope
        ],
        out_specs=pl.BlockSpec((None, Mo, cout), lambda n: (n, 0, 0)),
        compiler_params=_COMPILER_PARAMS,
        cost_estimate=cost,
    )(xw2, w_t, scale, bias, alpha)
    return out.reshape(N, Ho, Wo8, cout)[:, :, :Wo, :]


# ----------------------------------------------------------------------------
# Full encoder forward + parameters + pure-JAX reference
# ----------------------------------------------------------------------------
def jscc_encoder_forward(x_nchw, params, eps=1e-5):
    # NCHW (PyTorch) -> NHWC (kernel layout)
    x = jnp.transpose(x_nchw, (0, 2, 3, 1)).astype(jnp.float32)
    for p in params:
        if p["stride"] == 1:
            x = _layer_taps(x, p, eps)
        else:
            x = _layer_im2col(x, p, eps)
    # nn.Flatten() operates on the NCHW output: transpose back, then flatten.
    x_out = jnp.transpose(x, (0, 3, 1, 2))
    return x_out.reshape(x_out.shape[0], -1).astype(jnp.float32)


def init_params(key, in_channels=3, c_out=64):
    hidden_dims = [16, 32, 32, 32, c_out]
    strides = [2, 2, 1, 1, 1]
    params = []
    cin = in_channels
    for i, cout in enumerate(hidden_dims):
        key, k1, k2, k3, k4, k5 = jax.random.split(key, 6)
        params.append(dict(
            # PyTorch Conv2d weight layout: (C_out, C_in, KH, KW)
            w=jax.random.normal(k1, (cout, cin, KSIZE, KSIZE), jnp.float32) * 0.05,
            b=jax.random.normal(k2, (cout,), jnp.float32) * 0.05,
            gamma=1.0 + 0.1 * jax.random.normal(k3, (cout,), jnp.float32),
            beta=0.1 * jax.random.normal(k4, (cout,), jnp.float32),
            mean=0.1 * jax.random.normal(k5, (cout,), jnp.float32),
            var=jnp.ones((cout,), jnp.float32),
            alpha=jnp.float32(0.25),   # nn.PReLU() default: one shared slope
            stride=strides[i],
        ))
        cin = cout
    return params


def jscc_encoder_reference(x_nchw, params, eps=1e-5):
    """Pure-JAX f32 reference (eval-mode BatchNorm) for correctness checking."""
    x = jnp.transpose(x_nchw, (0, 2, 3, 1)).astype(jnp.float32)
    for p in params:
        xpad = jnp.pad(x, ((0, 0), (PAD, PAD), (PAD, PAD), (0, 0)))
        w = jnp.transpose(p["w"], (2, 3, 1, 0))            # HWIO
        y = jax.lax.conv_general_dilated(
            xpad, w, window_strides=(p["stride"], p["stride"]),
            padding="VALID",
            dimension_numbers=("NHWC", "HWIO", "NHWC")) + p["b"]
        scale = p["gamma"] / jnp.sqrt(p["var"] + eps)
        y = (y - p["mean"]) * scale + p["beta"]
        x = jnp.where(y > 0, y, p["alpha"] * y)
    x = jnp.transpose(x, (0, 3, 1, 2))
    return x.reshape(x.shape[0], -1)


if __name__ == "__main__":
    key = jax.random.PRNGKey(0)
    key, xkey = jax.random.split(key)
    # Small but shape-consistent input: batch=2, in_channels=3, 16x16 spatial.
    x = jax.random.normal(xkey, (2, 3, 16, 16), jnp.float32)
    params = init_params(key, in_channels=3, c_out=64)

    fwd = jax.jit(lambda inp: jscc_encoder_forward(inp, params))
    out = fwd(x)
    jax.block_until_ready(out)

    # Strides [2,2,1,1,1] take 16x16 -> 4x4; c_out=64 -> flatten to 1024.
    assert out.shape == (2, 64 * 4 * 4), out.shape
    assert bool(jnp.all(jnp.isfinite(out)))

    # Loose tolerance: kernel path uses bf16 MXU operands (f32 accumulation)
    # and bf16 inter-layer activations.
    ref = jscc_encoder_reference(x, params)
    err = float(jnp.max(jnp.abs(out - ref)))
    ref_mag = float(jnp.max(jnp.abs(ref)))
    assert err <= 0.05 * ref_mag + 5e-3, (err, ref_mag)

    print("KERNEL_OK")
</pallas_src>

<mosaic_0001>
module attributes {stable_mosaic.version = 11 : i64} {
  func.func @_conv_bn_prelu_kernel(%arg0: i32, %arg1: memref<128x128xbf16, #tpu.memory_space<vmem>>, %arg2: memref<1x128x16xbf16, #tpu.memory_space<vmem>>, %arg3: memref<1x16xf32, #tpu.memory_space<vmem>>, %arg4: memref<1x16xf32, #tpu.memory_space<vmem>>, %arg5: memref<1x1xf32, #tpu.memory_space<smem>>, %arg6: memref<128x16xbf16, #tpu.memory_space<vmem>>) attributes {dimension_semantics = [#tpu.dimension_semantics<parallel>], iteration_bounds = array<i64: 1>, scalar_prefetch = 0 : i64, scratch_operands = 0 : i64, tpu.core_type = #tpu.core_type<tc>, window_params = [{transform_indices = @transform_0, window_bounds = array<i64: 128, 128>}, {pipeline_mode = #tpu.pipeline_mode<synchronous>, transform_indices = @transform_1, window_bounds = array<i64: 1, 128, 16>}, {pipeline_mode = #tpu.pipeline_mode<synchronous>, transform_indices = @transform_2, window_bounds = array<i64: 1, 16>}, {pipeline_mode = #tpu.pipeline_mode<synchronous>, transform_indices = @transform_3, window_bounds = array<i64: 1, 16>}, {transform_indices = @transform_4, window_bounds = array<i64: 1, 1>}, {transform_indices = @transform_5, window_bounds = array<i64: 128, 16>}]} {
    %cst = arith.constant 0.000000e+00 : f32
    %0 = vector.broadcast %cst : f32 to vector<128x16xf32>
    %c0 = arith.constant 0 : index
    %c0_0 = arith.constant 0 : index
    %1 = vector.load %arg1[%c0, %c0_0] : memref<128x128xbf16, #tpu.memory_space<vmem>>, vector<128x128xbf16>
    %c0_1 = arith.constant 0 : index
    %c0_2 = arith.constant 0 : index
    %c0_3 = arith.constant 0 : index
    %2 = vector.load %arg2[%c0_1, %c0_2, %c0_3] : memref<1x128x16xbf16, #tpu.memory_space<vmem>>, vector<1x128x16xbf16>
    %3 = vector.shape_cast %2 : vector<1x128x16xbf16> to vector<128x16xbf16>
    %cst_4 = arith.constant dense<0.000000e+00> : vector<128x16xf32>
    %4 = tpu.matmul %1, %3, %cst_4 {dimension_numbers = #tpu.dot_dimension_numbers<[1], [0], [0], [1], [0, 0, 1, 1], [], []>} : vector<128x128xbf16>, vector<128x16xbf16>, vector<128x16xf32> -> vector<128x16xf32>
    %5 = arith.addf %0, %4 : vector<128x16xf32>
    %c0_5 = arith.constant 0 : index
    %c0_6 = arith.constant 0 : index
    %6 = vector.load %arg3[%c0_5, %c0_6] : memref<1x16xf32, #tpu.memory_space<vmem>>, vector<1x16xf32>
    %7 = vector.broadcast %6 : vector<1x16xf32> to vector<128x16xf32>
    %8 = arith.mulf %5, %7 : vector<128x16xf32>
    %c0_7 = arith.constant 0 : index
    %c0_8 = arith.constant 0 : index
    %9 = vector.load %arg4[%c0_7, %c0_8] : memref<1x16xf32, #tpu.memory_space<vmem>>, vector<1x16xf32>
    %10 = vector.broadcast %9 : vector<1x16xf32> to vector<128x16xf32>
    %11 = arith.addf %8, %10 : vector<128x16xf32>
    %c0_9 = arith.constant 0 : index
    %c0_10 = arith.constant 0 : index
    %12 = memref.load %arg5[%c0_9, %c0_10] : memref<1x1xf32, #tpu.memory_space<smem>>
    %cst_11 = arith.constant 0.000000e+00 : f32
    %13 = vector.broadcast %cst_11 : f32 to vector<128x16xf32>
    %14 = arith.cmpf ogt, %11, %13 : vector<128x16xf32>
    %15 = vector.broadcast %12 : f32 to vector<128x16xf32>
    %16 = arith.mulf %15, %11 : vector<128x16xf32>
    %17 = arith.select %14, %11, %16 : vector<128x16xi1>, vector<128x16xf32>
    %18 = arith.truncf %17 : vector<128x16xf32> to vector<128x16xbf16>
    %c0_12 = arith.constant 0 : index
    %c0_13 = arith.constant 0 : index
    %19 = vector.load %arg6[%c0_12, %c0_13] : memref<128x16xbf16, #tpu.memory_space<vmem>>, vector<128x16xbf16>
    tpu.vector_store %arg6[%c0_12, %c0_13], %18 {strides = array<i32>} : memref<128x16xbf16, #tpu.memory_space<vmem>>, vector<128x16xbf16>,
    return
  }
  func.func @transform_0(%arg0: i32) -> (i32, i32) {
    %c0_i32 = arith.constant 0 : i32
    %c0_i32_0 = arith.constant 0 : i32
    return %arg0, %c0_i32 : i32, i32
  }
  func.func @transform_1(%arg0: i32) -> (i32, i32, i32) {
    %c0_i32 = arith.constant 0 : i32
    %c0_i32_0 = arith.constant 0 : i32
    %c0_i32_1 = arith.constant 0 : i32
    %c0_i32_2 = arith.constant 0 : i32
    return %c0_i32, %c0_i32_0, %c0_i32_1 : i32, i32, i32
  }
  func.func @transform_2(%arg0: i32) -> (i32, i32) {
    %c0_i32 = arith.constant 0 : i32
    %c0_i32_0 = arith.constant 0 : i32
    %c0_i32_1 = arith.constant 0 : i32
    return %c0_i32, %c0_i32_0 : i32, i32
  }
  func.func @transform_3(%arg0: i32) -> (i32, i32) {
    %c0_i32 = arith.constant 0 : i32
    %c0_i32_0 = arith.constant 0 : i32
    %c0_i32_1 = arith.constant 0 : i32
    return %c0_i32, %c0_i32_0 : i32, i32
  }
  func.func @transform_4(%arg0: i32) -> (i32, i32) {
    %c0_i32 = arith.constant 0 : i32
    %c0_i32_0 = arith.constant 0 : i32
    %c0_i32_1 = arith.constant 0 : i32
    return %c0_i32, %c0_i32_0 : i32, i32
  }
  func.func @transform_5(%arg0: i32) -> (i32, i32) {
    %c0_i32 = arith.constant 0 : i32
    %c0_i32_0 = arith.constant 0 : i32
    return %arg0, %c0_i32 : i32, i32
  }
}

module attributes {stable_mosaic.version = 11 : i64} {
  func.func @_conv_bn_prelu_kernel(%arg0: i32, %arg1: memref<32x512xbf16, #tpu.memory_space<vmem>>, %arg2: memref<1x512x32xbf16, #tpu.memory_space<vmem>>, %arg3: memref<1x32xf32, #tpu.memory_space<vmem>>, %arg4: memref<1x32xf32, #tpu.memory_space<vmem>>, %arg5: memref<1x1xf32, #tpu.memory_space<smem>>, %arg6: memref<32x32xbf16, #tpu.memory_space<vmem>>) attributes {dimension_semantics = [#tpu.dimension_semantics<parallel>], iteration_bounds = array<i64: 1>, scalar_prefetch = 0 : i64, scratch_operands = 0 : i64, tpu.core_type = #tpu.core_type<tc>, window_params = [{transform_indices = @transform_0, window_bounds = array<i64: 32, 512>}, {pipeline_mode = #tpu.pipeline_mode<synchronous>, transform_indices = @transform_1, window_bounds = array<i64: 1, 512, 32>}, {pipeline_mode = #tpu.pipeline_mode<synchronous>, transform_indices = @transform_2, window_bounds = array<i64: 1, 32>}, {pipeline_mode = #tpu.pipeline_mode<synchronous>, transform_indices = @transform_3, window_bounds = array<i64: 1, 32>}, {transform_indices = @transform_4, window_bounds = array<i64: 1, 1>}, {transform_indices = @transform_5, window_bounds = array<i64: 32, 32>}]} {
    %cst = arith.constant 0.000000e+00 : f32
    %0 = vector.broadcast %cst : f32 to vector<32x32xf32>
    %c0 = arith.constant 0 : index
    %c0_0 = arith.constant 0 : index
    %1 = vector.load %arg1[%c0, %c0_0] : memref<32x512xbf16, #tpu.memory_space<vmem>>, vector<32x512xbf16>
    %c0_1 = arith.constant 0 : index
    %c0_2 = arith.constant 0 : index
    %c0_3 = arith.constant 0 : index
    %2 = vector.load %arg2[%c0_1, %c0_2, %c0_3] : memref<1x512x32xbf16, #tpu.memory_space<vmem>>, vector<1x512x32xbf16>
    %3 = vector.shape_cast %2 : vector<1x512x32xbf16> to vector<512x32xbf16>
    %cst_4 = arith.constant dense<0.000000e+00> : vector<32x32xf32>
    %4 = tpu.matmul %1, %3, %cst_4 {dimension_numbers = #tpu.dot_dimension_numbers<[1], [0], [0], [1], [0, 0, 1, 1], [], []>} : vector<32x512xbf16>, vector<512x32xbf16>, vector<32x32xf32> -> vector<32x32xf32>
    %5 = arith.addf %0, %4 : vector<32x32xf32>
    %c0_5 = arith.constant 0 : index
    %c0_6 = arith.constant 0 : index
    %6 = vector.load %arg3[%c0_5, %c0_6] : memref<1x32xf32, #tpu.memory_space<vmem>>, vector<1x32xf32>
    %7 = vector.broadcast %6 : vector<1x32xf32> to vector<32x32xf32>
    %8 = arith.mulf %5, %7 : vector<32x32xf32>
    %c0_7 = arith.constant 0 : index
    %c0_8 = arith.constant 0 : index
    %9 = vector.load %arg4[%c0_7, %c0_8] : memref<1x32xf32, #tpu.memory_space<vmem>>, vector<1x32xf32>
    %10 = vector.broadcast %9 : vector<1x32xf32> to vector<32x32xf32>
    %11 = arith.addf %8, %10 : vector<32x32xf32>
    %c0_9 = arith.constant 0 : index
    %c0_10 = arith.constant 0 : index
    %12 = memref.load %arg5[%c0_9, %c0_10] : memref<1x1xf32, #tpu.memory_space<smem>>
    %cst_11 = arith.constant 0.000000e+00 : f32
    %13 = vector.broadcast %cst_11 : f32 to vector<32x32xf32>
    %14 = arith.cmpf ogt, %11, %13 : vector<32x32xf32>
    %15 = vector.broadcast %12 : f32 to vector<32x32xf32>
    %16 = arith.mulf %15, %11 : vector<32x32xf32>
    %17 = arith.select %14, %11, %16 : vector<32x32xi1>, vector<32x32xf32>
    %18 = arith.truncf %17 : vector<32x32xf32> to vector<32x32xbf16>
    %c0_12 = arith.constant 0 : index
    %c0_13 = arith.constant 0 : index
    %19 = vector.load %arg6[%c0_12, %c0_13] : memref<32x32xbf16, #tpu.memory_space<vmem>>, vector<32x32xbf16>
    tpu.vector_store %arg6[%c0_12, %c0_13], %18 {strides = array<i32>} : memref<32x32xbf16, #tpu.memory_space<vmem>>, vector<32x32xbf16>,
    return
  }
  func.func @transform_0(%arg0: i32) -> (i32, i32) {
    %c0_i32 = arith.constant 0 : i32
    %c0_i32_0 = arith.constant 0 : i32
    return %arg0, %c0_i32 : i32, i32
  }
  func.func @transform_1(%arg0: i32) -> (i32, i32, i32) {
    %c0_i32 = arith.constant 0 : i32
    %c0_i32_0 = arith.constant 0 : i32
    %c0_i32_1 = arith.constant 0 : i32
    %c0_i32_2 = arith.constant 0 : i32
    return %c0_i32, %c0_i32_0, %c0_i32_1 : i32, i32, i32
  }
  func.func @transform_2(%arg0: i32) -> (i32, i32) {
    %c0_i32 = arith.constant 0 : i32
    %c0_i32_0 = arith.constant 0 : i32
    %c0_i32_1 = arith.constant 0 : i32
    return %c0_i32, %c0_i32_0 : i32, i32
  }
  func.func @transform_3(%arg0: i32) -> (i32, i32) {
    %c0_i32 = arith.constant 0 : i32
    %c0_i32_0 = arith.constant 0 : i32
    %c0_i32_1 = arith.constant 0 : i32
    return %c0_i32, %c0_i32_0 : i32, i32
  }
  func.func @transform_4(%arg0: i32) -> (i32, i32) {
    %c0_i32 = arith.constant 0 : i32
    %c0_i32_0 = arith.constant 0 : i32
    %c0_i32_1 = arith.constant 0 : i32
    return %c0_i32, %c0_i32_0 : i32, i32
  }
  func.func @transform_5(%arg0: i32) -> (i32, i32) {
    %c0_i32 = arith.constant 0 : i32
    %c0_i32_0 = arith.constant 0 : i32
    return %arg0, %c0_i32 : i32, i32
  }
}

module attributes {stable_mosaic.version = 11 : i64} {
  func.func @_conv_bn_prelu_kernel(%arg0: i32, %arg1: memref<1x64x160xbf16, #tpu.memory_space<vmem>>, %arg2: memref<5x160x64xbf16, #tpu.memory_space<vmem>>, %arg3: memref<1x64xf32, #tpu.memory_space<vmem>>, %arg4: memref<1x64xf32, #tpu.memory_space<vmem>>, %arg5: memref<1x1xf32, #tpu.memory_space<smem>>, %arg6: memref<1x32x64xbf16, #tpu.memory_space<vmem>>) attributes {dimension_semantics = [#tpu.dimension_semantics<parallel>], iteration_bounds = array<i64: 2>, scalar_prefetch = 0 : i64, scratch_operands = 0 : i64, tpu.core_type = #tpu.core_type<tc>, window_params = [{transform_indices = @transform_0, window_bounds = array<i64: 1, 64, 160>}, {pipeline_mode = #tpu.pipeline_mode<synchronous>, transform_indices = @transform_1, window_bounds = array<i64: 5, 160, 64>}, {pipeline_mode = #tpu.pipeline_mode<synchronous>, transform_indices = @transform_2, window_bounds = array<i64: 1, 64>}, {pipeline_mode = #tpu.pipeline_mode<synchronous>, transform_indices = @transform_3, window_bounds = array<i64: 1, 64>}, {transform_indices = @transform_4, window_bounds = array<i64: 1, 1>}, {transform_indices = @transform_5, window_bounds = array<i64: 1, 32, 64>}]} {
    %cst = arith.constant 0.000000e+00 : f32
    %0 = vector.broadcast %cst : f32 to vector<32x64xf32>
    %c0 = arith.constant 0 : index
    %c0_0 = arith.constant 0 : index
    %c0_1 = arith.constant 0 : index
    %1 = vector.load %arg1[%c0, %c0_0, %c0_1] : memref<1x64x160xbf16, #tpu.memory_space<vmem>>, vector<1x32x160xbf16>
    %2 = vector.shape_cast %1 : vector<1x32x160xbf16> to vector<32x160xbf16>
    %c0_2 = arith.constant 0 : index
    %c0_3 = arith.constant 0 : index
    %c0_4 = arith.constant 0 : index
    %3 = vector.load %arg2[%c0_2, %c0_3, %c0_4] : memref<5x160x64xbf16, #tpu.memory_space<vmem>>, vector<1x160x64xbf16>
    %4 = vector.shape_cast %3 : vector<1x160x64xbf16> to vector<160x64xbf16>
    %cst_5 = arith.constant dense<0.000000e+00> : vector<32x64xf32>
    %5 = tpu.matmul %2, %4, %cst_5 {dimension_numbers = #tpu.dot_dimension_numbers<[1], [0], [0], [1], [0, 0, 1, 1], [], []>} : vector<32x160xbf16>, vector<160x64xbf16>, vector<32x64xf32> -> vector<32x64xf32>
    %6 = arith.addf %0, %5 : vector<32x64xf32>
    %c0_6 = arith.constant 0 : index
    %c8 = arith.constant 8 : index
    %c0_7 = arith.constant 0 : index
    %7 = vector.load %arg1[%c0_6, %c8, %c0_7] : memref<1x64x160xbf16, #tpu.memory_space<vmem>>, vector<1x32x160xbf16>
    %8 = vector.shape_cast %7 : vector<1x32x160xbf16> to vector<32x160xbf16>
    %c1 = arith.constant 1 : index
    %c0_8 = arith.constant 0 : index
    %c0_9 = arith.constant 0 : index
    %9 = vector.load %arg2[%c1, %c0_8, %c0_9] : memref<5x160x64xbf16, #tpu.memory_space<vmem>>, vector<1x160x64xbf16>
    %10 = vector.shape_cast %9 : vector<1x160x64xbf16> to vector<160x64xbf16>
    %cst_10 = arith.constant dense<0.000000e+00> : vector<32x64xf32>
    %11 = tpu.matmul %8, %10, %cst_10 {dimension_numbers = #tpu.dot_dimension_numbers<[1], [0], [0], [1], [0, 0, 1, 1], [], []>} : vector<32x160xbf16>, vector<160x64xbf16>, vector<32x64xf32> -> vector<32x64xf32>
    %12 = arith.addf %6, %11 : vector<32x64xf32>
    %c0_11 = arith.constant 0 : index
    %c16 = arith.constant 16 : index
    %c0_12 = arith.constant 0 : index
    %13 = vector.load %arg1[%c0_11, %c16, %c0_12] : memref<1x64x160xbf16, #tpu.memory_space<vmem>>, vector<1x32x160xbf16>
    %14 = vector.shape_cast %13 : vector<1x32x160xbf16> to vector<32x160xbf16>
    %c2 = arith.constant 2 : index
    %c0_13 = arith.constant 0 : index
    %c0_14 = arith.constant 0 : index
    %15 = vector.load %arg2[%c2, %c0_13, %c0_14] : memref<5x160x64xbf16, #tpu.memory_space<vmem>>, vector<1x160x64xbf16>
    %16 = vector.shape_cast %15 : vector<1x160x64xbf16> to vector<160x64xbf16>
    %cst_15 = arith.constant dense<0.000000e+00> : vector<32x64xf32>
    %17 = tpu.matmul %14, %16, %cst_15 {dimension_numbers = #tpu.dot_dimension_numbers<[1], [0], [0], [1], [0, 0, 1, 1], [], []>} : vector<32x160xbf16>, vector<160x64xbf16>, vector<32x64xf32> -> vector<32x64xf32>
    %18 = arith.addf %12, %17 : vector<32x64xf32>
    %c0_16 = arith.constant 0 : index
    %c24 = arith.constant 24 : index
    %c0_17 = arith.constant 0 : index
    %19 = vector.load %arg1[%c0_16, %c24, %c0_17] : memref<1x64x160xbf16, #tpu.memory_space<vmem>>, vector<1x32x160xbf16>
    %20 = vector.shape_cast %19 : vector<1x32x160xbf16> to vector<32x160xbf16>
    %c3 = arith.constant 3 : index
    %c0_18 = arith.constant 0 : index
    %c0_19 = arith.constant 0 : index
    %21 = vector.load %arg2[%c3, %c0_18, %c0_19] : memref<5x160x64xbf16, #tpu.memory_space<vmem>>, vector<1x160x64xbf16>
    %22 = vector.shape_cast %21 : vector<1x160x64xbf16> to vector<160x64xbf16>
    %cst_20 = arith.constant dense<0.000000e+00> : vector<32x64xf32>
    %23 = tpu.matmul %20, %22, %cst_20 {dimension_numbers = #tpu.dot_dimension_numbers<[1], [0], [0], [1], [0, 0, 1, 1], [], []>} : vector<32x160xbf16>, vector<160x64xbf16>, vector<32x64xf32> -> vector<32x64xf32>
    %24 = arith.addf %18, %23 : vector<32x64xf32>
    %c0_21 = arith.constant 0 : index
    %c32 = arith.constant 32 : index
    %c0_22 = arith.constant 0 : index
    %25 = vector.load %arg1[%c0_21, %c32, %c0_22] : memref<1x64x160xbf16, #tpu.memory_space<vmem>>, vector<1x32x160xbf16>
    %26 = vector.shape_cast %25 : vector<1x32x160xbf16> to vector<32x160xbf16>
    %c4 = arith.constant 4 : index
    %c0_23 = arith.constant 0 : index
    %c0_24 = arith.constant 0 : index
    %27 = vector.load %arg2[%c4, %c0_23, %c0_24] : memref<5x160x64xbf16, #tpu.memory_space<vmem>>, vector<1x160x64xbf16>
    %28 = vector.shape_cast %27 : vector<1x160x64xbf16> to vector<160x64xbf16>
    %cst_25 = arith.constant dense<0.000000e+00> : vector<32x64xf32>
    %29 = tpu.matmul %26, %28, %cst_25 {dimension_numbers = #tpu.dot_dimension_numbers<[1], [0], [0], [1], [0, 0, 1, 1], [], []>} : vector<32x160xbf16>, vector<160x64xbf16>, vector<32x64xf32> -> vector<32x64xf32>
    %30 = arith.addf %24, %29 : vector<32x64xf32>
    %c0_26 = arith.constant 0 : index
    %c0_27 = arith.constant 0 : index
    %31 = vector.load %arg3[%c0_26, %c0_27] : memref<1x64xf32, #tpu.memory_space<vmem>>, vector<1x64xf32>
    %32 = vector.broadcast %31 : vector<1x64xf32> to vector<32x64xf32>
    %33 = arith.mulf %30, %32 : vector<32x64xf32>
    %c0_28 = arith.constant 0 : index
    %c0_29 = arith.constant 0 : index
    %34 = vector.load %arg4[%c0_28, %c0_29] : memref<1x64xf32, #tpu.memory_space<vmem>>, vector<1x64xf32>
    %35 = vector.broadcast %34 : vector<1x64xf32> to vector<32x64xf32>
    %36 = arith.addf %33, %35 : vector<32x64xf32>
    %c0_30 = arith.constant 0 : index
    %c0_31 = arith.constant 0 : index
    %37 = memref.load %arg5[%c0_30, %c0_31] : memref<1x1xf32, #tpu.memory_space<smem>>
    %cst_32 = arith.constant 0.000000e+00 : f32
    %38 = vector.broadcast %cst_32 : f32 to vector<32x64xf32>
    %39 = arith.cmpf ogt, %36, %38 : vector<32x64xf32>
    %40 = vector.broadcast %37 : f32 to vector<32x64xf32>
    %41 = arith.mulf %40, %36 : vector<32x64xf32>
    %42 = arith.select %39, %36, %41 : vector<32x64xi1>, vector<32x64xf32>
    %43 = arith.truncf %42 : vector<32x64xf32> to vector<32x64xbf16>
    %c0_33 = arith.constant 0 : index
    %c0_34 = arith.constant 0 : index
    %c0_35 = arith.constant 0 : index
    %44 = vector.load %arg6[%c0_33, %c0_34, %c0_35] : memref<1x32x64xbf16, #tpu.memory_space<vmem>>, vector<1x32x64xbf16>
    %45 = vector.shape_cast %44 : vector<1x32x64xbf16> to vector<32x64xbf16>
    %46 = vector.shape_cast %43 : vector<32x64xbf16> to vector<1x32x64xbf16>
    tpu.vector_store %arg6[%c0_33, %c0_34, %c0_35], %46 {strides = array<i32>} : memref<1x32x64xbf16, #tpu.memory_space<vmem>>, vector<1x32x64xbf16>,
    return
  }
  func.func @transform_0(%arg0: i32) -> (i32, i32, i32) {
    %c0_i32 = arith.constant 0 : i32
    %c0_i32_0 = arith.constant 0 : i32
    %c0_i32_1 = arith.constant 0 : i32
    return %arg0, %c0_i32, %c0_i32_0 : i32, i32, i32
  }
  func.func @transform_1(%arg0: i32) -> (i32, i32, i32) {
    %c0_i32 = arith.constant 0 : i32
    %c0_i32_0 = arith.constant 0 : i32
    %c0_i32_1 = arith.constant 0 : i32
    %c0_i32_2 = arith.constant 0 : i32
    return %c0_i32, %c0_i32_0, %c0_i32_1 : i32, i32, i32
  }
  func.func @transform_2(%arg0: i32) -> (i32, i32) {
    %c0_i32 = arith.constant 0 : i32
    %c0_i32_0 = arith.constant 0 : i32
    %c0_i32_1 = arith.constant 0 : i32
    return %c0_i32, %c0_i32_0 : i32, i32
  }
  func.func @transform_3(%arg0: i32) -> (i32, i32) {
    %c0_i32 = arith.constant 0 : i32
    %c0_i32_0 = arith.constant 0 : i32
    %c0_i32_1 = arith.constant 0 : i32
    return %c0_i32, %c0_i32_0 : i32, i32
  }
  func.func @transform_4(%arg0: i32) -> (i32, i32) {
    %c0_i32 = arith.constant 0 : i32
    %c0_i32_0 = arith.constant 0 : i32
    %c0_i32_1 = arith.constant 0 : i32
    return %c0_i32, %c0_i32_0 : i32, i32
  }
  func.func @transform_5(%arg0: i32) -> (i32, i32, i32) {
    %c0_i32 = arith.constant 0 : i32
    %c0_i32_0 = arith.constant 0 : i32
    %c0_i32_1 = arith.constant 0 : i32
    return %arg0, %c0_i32, %c0_i32_0 : i32, i32, i32
  }
}

module attributes {stable_mosaic.version = 11 : i64} {
  func.func @_conv_bn_prelu_kernel(%arg0: i32, %arg1: memref<1x64x160xbf16, #tpu.memory_space<vmem>>, %arg2: memref<5x160x32xbf16, #tpu.memory_space<vmem>>, %arg3: memref<1x32xf32, #tpu.memory_space<vmem>>, %arg4: memref<1x32xf32, #tpu.memory_space<vmem>>, %arg5: memref<1x1xf32, #tpu.memory_space<smem>>, %arg6: memref<1x32x32xbf16, #tpu.memory_space<vmem>>) attributes {dimension_semantics = [#tpu.dimension_semantics<parallel>], iteration_bounds = array<i64: 2>, scalar_prefetch = 0 : i64, scratch_operands = 0 : i64, tpu.core_type = #tpu.core_type<tc>, window_params = [{transform_indices = @transform_0, window_bounds = array<i64: 1, 64, 160>}, {pipeline_mode = #tpu.pipeline_mode<synchronous>, transform_indices = @transform_1, window_bounds = array<i64: 5, 160, 32>}, {pipeline_mode = #tpu.pipeline_mode<synchronous>, transform_indices = @transform_2, window_bounds = array<i64: 1, 32>}, {pipeline_mode = #tpu.pipeline_mode<synchronous>, transform_indices = @transform_3, window_bounds = array<i64: 1, 32>}, {transform_indices = @transform_4, window_bounds = array<i64: 1, 1>}, {transform_indices = @transform_5, window_bounds = array<i64: 1, 32, 32>}]} {
    %cst = arith.constant 0.000000e+00 : f32
    %0 = vector.broadcast %cst : f32 to vector<32x32xf32>
    %c0 = arith.constant 0 : index
    %c0_0 = arith.constant 0 : index
    %c0_1 = arith.constant 0 : index
    %1 = vector.load %arg1[%c0, %c0_0, %c0_1] : memref<1x64x160xbf16, #tpu.memory_space<vmem>>, vector<1x32x160xbf16>
    %2 = vector.shape_cast %1 : vector<1x32x160xbf16> to vector<32x160xbf16>
    %c0_2 = arith.constant 0 : index
    %c0_3 = arith.constant 0 : index
    %c0_4 = arith.constant 0 : index
    %3 = vector.load %arg2[%c0_2, %c0_3, %c0_4] : memref<5x160x32xbf16, #tpu.memory_space<vmem>>, vector<1x160x32xbf16>
    %4 = vector.shape_cast %3 : vector<1x160x32xbf16> to vector<160x32xbf16>
    %cst_5 = arith.constant dense<0.000000e+00> : vector<32x32xf32>
    %5 = tpu.matmul %2, %4, %cst_5 {dimension_numbers = #tpu.dot_dimension_numbers<[1], [0], [0], [1], [0, 0, 1, 1], [], []>} : vector<32x160xbf16>, vector<160x32xbf16>, vector<32x32xf32> -> vector<32x32xf32>
    %6 = arith.addf %0, %5 : vector<32x32xf32>
    %c0_6 = arith.constant 0 : index
    %c8 = arith.constant 8 : index
    %c0_7 = arith.constant 0 : index
    %7 = vector.load %arg1[%c0_6, %c8, %c0_7] : memref<1x64x160xbf16, #tpu.memory_space<vmem>>, vector<1x32x160xbf16>
    %8 = vector.shape_cast %7 : vector<1x32x160xbf16> to vector<32x160xbf16>
    %c1 = arith.constant 1 : index
    %c0_8 = arith.constant 0 : index
    %c0_9 = arith.constant 0 : index
    %9 = vector.load %arg2[%c1, %c0_8, %c0_9] : memref<5x160x32xbf16, #tpu.memory_space<vmem>>, vector<1x160x32xbf16>
    %10 = vector.shape_cast %9 : vector<1x160x32xbf16> to vector<160x32xbf16>
    %cst_10 = arith.constant dense<0.000000e+00> : vector<32x32xf32>
    %11 = tpu.matmul %8, %10, %cst_10 {dimension_numbers = #tpu.dot_dimension_numbers<[1], [0], [0], [1], [0, 0, 1, 1], [], []>} : vector<32x160xbf16>, vector<160x32xbf16>, vector<32x32xf32> -> vector<32x32xf32>
    %12 = arith.addf %6, %11 : vector<32x32xf32>
    %c0_11 = arith.constant 0 : index
    %c16 = arith.constant 16 : index
    %c0_12 = arith.constant 0 : index
    %13 = vector.load %arg1[%c0_11, %c16, %c0_12] : memref<1x64x160xbf16, #tpu.memory_space<vmem>>, vector<1x32x160xbf16>
    %14 = vector.shape_cast %13 : vector<1x32x160xbf16> to vector<32x160xbf16>
    %c2 = arith.constant 2 : index
    %c0_13 = arith.constant 0 : index
    %c0_14 = arith.constant 0 : index
    %15 = vector.load %arg2[%c2, %c0_13, %c0_14] : memref<5x160x32xbf16, #tpu.memory_space<vmem>>, vector<1x160x32xbf16>
    %16 = vector.shape_cast %15 : vector<1x160x32xbf16> to vector<160x32xbf16>
    %cst_15 = arith.constant dense<0.000000e+00> : vector<32x32xf32>
    %17 = tpu.matmul %14, %16, %cst_15 {dimension_numbers = #tpu.dot_dimension_numbers<[1], [0], [0], [1], [0, 0, 1, 1], [], []>} : vector<32x160xbf16>, vector<160x32xbf16>, vector<32x32xf32> -> vector<32x32xf32>
    %18 = arith.addf %12, %17 : vector<32x32xf32>
    %c0_16 = arith.constant 0 : index
    %c24 = arith.constant 24 : index
    %c0_17 = arith.constant 0 : index
    %19 = vector.load %arg1[%c0_16, %c24, %c0_17] : memref<1x64x160xbf16, #tpu.memory_space<vmem>>, vector<1x32x160xbf16>
    %20 = vector.shape_cast %19 : vector<1x32x160xbf16> to vector<32x160xbf16>
    %c3 = arith.constant 3 : index
    %c0_18 = arith.constant 0 : index
    %c0_19 = arith.constant 0 : index
    %21 = vector.load %arg2[%c3, %c0_18, %c0_19] : memref<5x160x32xbf16, #tpu.memory_space<vmem>>, vector<1x160x32xbf16>
    %22 = vector.shape_cast %21 : vector<1x160x32xbf16> to vector<160x32xbf16>
    %cst_20 = arith.constant dense<0.000000e+00> : vector<32x32xf32>
    %23 = tpu.matmul %20, %22, %cst_20 {dimension_numbers = #tpu.dot_dimension_numbers<[1], [0], [0], [1], [0, 0, 1, 1], [], []>} : vector<32x160xbf16>, vector<160x32xbf16>, vector<32x32xf32> -> vector<32x32xf32>
    %24 = arith.addf %18, %23 : vector<32x32xf32>
    %c0_21 = arith.constant 0 : index
    %c32 = arith.constant 32 : index
    %c0_22 = arith.constant 0 : index
    %25 = vector.load %arg1[%c0_21, %c32, %c0_22] : memref<1x64x160xbf16, #tpu.memory_space<vmem>>, vector<1x32x160xbf16>
    %26 = vector.shape_cast %25 : vector<1x32x160xbf16> to vector<32x160xbf16>
    %c4 = arith.constant 4 : index
    %c0_23 = arith.constant 0 : index
    %c0_24 = arith.constant 0 : index
    %27 = vector.load %arg2[%c4, %c0_23, %c0_24] : memref<5x160x32xbf16, #tpu.memory_space<vmem>>, vector<1x160x32xbf16>
    %28 = vector.shape_cast %27 : vector<1x160x32xbf16> to vector<160x32xbf16>
    %cst_25 = arith.constant dense<0.000000e+00> : vector<32x32xf32>
    %29 = tpu.matmul %26, %28, %cst_25 {dimension_numbers = #tpu.dot_dimension_numbers<[1], [0], [0], [1], [0, 0, 1, 1], [], []>} : vector<32x160xbf16>, vector<160x32xbf16>, vector<32x32xf32> -> vector<32x32xf32>
    %30 = arith.addf %24, %29 : vector<32x32xf32>
    %c0_26 = arith.constant 0 : index
    %c0_27 = arith.constant 0 : index
    %31 = vector.load %arg3[%c0_26, %c0_27] : memref<1x32xf32, #tpu.memory_space<vmem>>, vector<1x32xf32>
    %32 = vector.broadcast %31 : vector<1x32xf32> to vector<32x32xf32>
    %33 = arith.mulf %30, %32 : vector<32x32xf32>
    %c0_28 = arith.constant 0 : index
    %c0_29 = arith.constant 0 : index
    %34 = vector.load %arg4[%c0_28, %c0_29] : memref<1x32xf32, #tpu.memory_space<vmem>>, vector<1x32xf32>
    %35 = vector.broadcast %34 : vector<1x32xf32> to vector<32x32xf32>
    %36 = arith.addf %33, %35 : vector<32x32xf32>
    %c0_30 = arith.constant 0 : index
    %c0_31 = arith.constant 0 : index
    %37 = memref.load %arg5[%c0_30, %c0_31] : memref<1x1xf32, #tpu.memory_space<smem>>
    %cst_32 = arith.constant 0.000000e+00 : f32
    %38 = vector.broadcast %cst_32 : f32 to vector<32x32xf32>
    %39 = arith.cmpf ogt, %36, %38 : vector<32x32xf32>
    %40 = vector.broadcast %37 : f32 to vector<32x32xf32>
    %41 = arith.mulf %40, %36 : vector<32x32xf32>
    %42 = arith.select %39, %36, %41 : vector<32x32xi1>, vector<32x32xf32>
    %43 = arith.truncf %42 : vector<32x32xf32> to vector<32x32xbf16>
    %c0_33 = arith.constant 0 : index
    %c0_34 = arith.constant 0 : index
    %c0_35 = arith.constant 0 : index
    %44 = vector.load %arg6[%c0_33, %c0_34, %c0_35] : memref<1x32x32xbf16, #tpu.memory_space<vmem>>, vector<1x32x32xbf16>
    %45 = vector.shape_cast %44 : vector<1x32x32xbf16> to vector<32x32xbf16>
    %46 = vector.shape_cast %43 : vector<32x32xbf16> to vector<1x32x32xbf16>
    tpu.vector_store %arg6[%c0_33, %c0_34, %c0_35], %46 {strides = array<i32>} : memref<1x32x32xbf16, #tpu.memory_space<vmem>>, vector<1x32x32xbf16>,
    return
  }
  func.func @transform_0(%arg0: i32) -> (i32, i32, i32) {
    %c0_i32 = arith.constant 0 : i32
    %c0_i32_0 = arith.constant 0 : i32
    %c0_i32_1 = arith.constant 0 : i32
    return %arg0, %c0_i32, %c0_i32_0 : i32, i32, i32
  }
  func.func @transform_1(%arg0: i32) -> (i32, i32, i32) {
    %c0_i32 = arith.constant 0 : i32
    %c0_i32_0 = arith.constant 0 : i32
    %c0_i32_1 = arith.constant 0 : i32
    %c0_i32_2 = arith.constant 0 : i32
    return %c0_i32, %c0_i32_0, %c0_i32_1 : i32, i32, i32
  }
  func.func @transform_2(%arg0: i32) -> (i32, i32) {
    %c0_i32 = arith.constant 0 : i32
    %c0_i32_0 = arith.constant 0 : i32
    %c0_i32_1 = arith.constant 0 : i32
    return %c0_i32, %c0_i32_0 : i32, i32
  }
  func.func @transform_3(%arg0: i32) -> (i32, i32) {
    %c0_i32 = arith.constant 0 : i32
    %c0_i32_0 = arith.constant 0 : i32
    %c0_i32_1 = arith.constant 0 : i32
    return %c0_i32, %c0_i32_0 : i32, i32
  }
  func.func @transform_4(%arg0: i32) -> (i32, i32) {
    %c0_i32 = arith.constant 0 : i32
    %c0_i32_0 = arith.constant 0 : i32
    %c0_i32_1 = arith.constant 0 : i32
    return %c0_i32, %c0_i32_0 : i32, i32
  }
  func.func @transform_5(%arg0: i32) -> (i32, i32, i32) {
    %c0_i32 = arith.constant 0 : i32
    %c0_i32_0 = arith.constant 0 : i32
    %c0_i32_1 = arith.constant 0 : i32
    return %arg0, %c0_i32, %c0_i32_0 : i32, i32, i32
  }
}

</mosaic_0001>

<bundles_post_ra>
// kernel: _lambda_.5
= control target key start
LH: loop header
LB: loop body
LE: loop exit
PB: predicated region body
PF: predicated region fallthrough
CT: control target
= control target key end

     0   :  { %vm407_vm0 = vcmask 125952   ;;  %s763_s1 = inlined_call_operand.vmem [shape: bf16[1,128,16], index: 1, kind: input, shape index: {}]   ;;  %s764_s0 = inlined_call_operand.vmem [shape: bf16[128,128], index: 0, kind: input, shape index: {}]   ;;  %s765_s2 = inlined_call_operand.vmem [shape: f32[1,16], index: 2, kind: input, shape index: {}]   ;;  %s766_s3 = inlined_call_operand.vmem [shape: f32[1,16], index: 3, kind: input, shape index: {}]   ;;  %s767_s4 = inlined_call_operand.<no memory space> [shape: f32[1,1], index: 4, kind: input, shape index: {}]   ;;  %s768_s5 = inlined_call_operand.vmem [shape: bf16[128,16], index: 5, kind: output, shape index: {}]  }
   0x1   :  { %v542_v0 = vld [vmem:[%s763_s1] sm:$0xff]   ;;  %v543_v1 = vld [vmem:[%s763_s1 + $0x8] sm:$0xff]   ;;  %v544_v2 = vld [vmem:[%s763_s1 + $0x10] sm:$0xff]   ;;  %v651_v24 = vstv %s767_s4 }
   0x2   :  { %494 = vmatprep.subr.bf16.mxu0 %v542_v0  ;;  %526 = vmatprep.subr.bf16.mxu1 %v542_v0  ;;  %v545_v3 = vld [vmem:[%s763_s1 + $0x18] sm:$0xff]   ;;  %v550_v4 = vld [vmem:[%s764_s0] sm:$0xff]   ;;  %v547_v7 = vld [vmem:[%s763_s1 + $0x28] sm:$0xff]  }
   0x3   :  { %495 = vmatpush3.bf16.msra.mxu0 %v542_v0  ;;  %534 = vmatpush3.bf16.msra.mxu1 %v542_v0  ;;  %v551_v5 = vld [vmem:[%s764_s0 + $0x20] sm:$0xff]   ;;  %v548_v8 = vld [vmem:[%s763_s1 + $0x30] sm:$0xff]   ;;  %v549_v9 = vld [vmem:[%s763_s1 + $0x38] sm:$0xff]  }
   0x4   :  { %496 = vmatprep.subr.bf16.mxu0 %v543_v1  ;;  %527 = vmatprep.subr.bf16.mxu1 %v543_v1  ;;  %v546_v6 = vld [vmem:[%s763_s1 + $0x20] sm:$0xff]   ;;  %v552_v10 = vld [vmem:[%s764_s0 + $0x8] sm:$0xff]   ;;  %v554_v12 = vld [vmem:[%s764_s0 + $0x10] sm:$0xff]  }
   0x5   :  { %510 = vmatprep.mubr.bf16.mxu0 %v550_v4  ;;  %518 = vmatprep.mubr.bf16.mxu1 %v551_v5  ;;  %v553_v11 = vld [vmem:[%s764_s0 + $0x28] sm:$0xff]   ;;  %v555_v13 = vld [vmem:[%s764_s0 + $0x30] sm:$0xff]   ;;  %v556_v14 = vld [vmem:[%s764_s0 + $0x18] sm:$0xff]  }
   0x6   :  { %v557_v15 = vld [vmem:[%s764_s0 + $0x38] sm:$0xff]   ;;  %v639_v16 = vld [vmem:[%s765_s2] ss:$0 sm:$0xff] }
   0x7   :  { %497 = vmatpush3.bf16.msra.mxu0 %v543_v1  ;;  %535 = vmatpush3.bf16.msra.mxu1 %v543_v1  ;;  %v644_v18 = vld [vmem:[%s766_s3] ss:$0 sm:$0xff] }
   0x8   :  { %498 = vmatprep.subr.bf16.mxu0 %v544_v2  ;;  %528 = vmatprep.subr.bf16.mxu1 %v544_v2 }
   0xb   :  { %499 = vmatpush3.bf16.msra.mxu0 %v544_v2  ;;  %536 = vmatpush3.bf16.msra.mxu1 %v544_v2 }
   0xc   :  { %500 = vmatprep.subr.bf16.mxu0 %v545_v3  ;;  %529 = vmatprep.subr.bf16.mxu1 %v545_v3 }
   0xf   :  { %501 = vmatpush3.bf16.msra.mxu0 %v545_v3  ;;  %537 = vmatpush3.bf16.msra.mxu1 %v545_v3 }
  0x10   :  { %502 = vmatprep.subr.bf16.mxu0 %v546_v6  ;;  %530 = vmatprep.subr.bf16.mxu1 %v546_v6 }
  0x13   :  { %503 = vmatpush3.bf16.msra.mxu0 %v546_v6  ;;  %538 = vmatpush3.bf16.msra.mxu1 %v546_v6 }
  0x14   :  { %504 = vmatprep.subr.bf16.mxu0 %v547_v7  ;;  %531 = vmatprep.subr.bf16.mxu1 %v547_v7 }
  0x17   :  { %505 = vmatpush3.bf16.msra.mxu0 %v547_v7  ;;  %539 = vmatpush3.bf16.msra.mxu1 %v547_v7 }
  0x18   :  { %506 = vmatprep.subr.bf16.mxu0 %v548_v8  ;;  %532 = vmatprep.subr.bf16.mxu1 %v548_v8 }
  0x1b   :  { %507 = vmatpush3.bf16.msra.mxu0 %v548_v8  ;;  %540 = vmatpush3.bf16.msra.mxu1 %v548_v8 }
  0x1c   :  { %508 = vmatprep.subr.bf16.mxu0 %v549_v9  ;;  %533 = vmatprep.subr.bf16.mxu1 %v549_v9 }
  0x1f   :  { %509 = vmatpush3.bf16.msra.mxu0 %v549_v9  ;;  %541 = vmatpush3.bf16.msra.mxu1 %v549_v9 }
  0x22   :  { %511 = vmatmul.mubr.bf16.vlgmr.msra.gmra.mrb[0].mxu0 %v552_v10  ;;  %519 = vmatmul.mubr.bf16.vlgmr.msra.gmra.mrb[0].mxu1 %v553_v11 }
  0x23   :  { %514 = vmatprep.mubr.bf16.mxu0 %v554_v12  ;;  %522 = vmatprep.mubr.bf16.mxu1 %v555_v13 }
  0x2a   :  { %515 = vmatmul.mubr.bf16.gmra.mrb[4].mxu0 %v556_v14  ;;  %523 = vmatmul.mubr.bf16.gmra.mrb[4].mxu1 %v557_v15 }
  0xf5   :  { %v512_v17 = vpop.f32.mrb[0].mxu0  ;;  %v520_v19 = vpop.f32.mrb[0].mxu1 }
  0xf6   :  { %v256_v20 = vmul.f32 %v512_v17, %v639_v16  ;;  %v264_v21 = vmul.f32 %v520_v19, %v639_v16  ;;  %v184_v22 = vpop.f32.mrb[1].mxu0  ;;  %v216_v23 = vpop.f32.mrb[1].mxu1 }
  0xf7   :  { %v254_v25 = vmul.f32 %v639_v16, %v184_v22  ;;  %v262_v26 = vmul.f32 %v639_v16, %v216_v23  ;;  %v513_v27 = vpop.f32.mrb[2].mxu0  ;;  %v521_v28 = vpop.f32.mrb[2].mxu1 }
  0xf8   :  { %v279_v29 = vadd.f32 %v644_v18, %v256_v20  ;;  %v287_v30 = vadd.f32 %v644_v18, %v264_v21  ;;  %v257_v31 = vmul.f32 %v513_v27, %v639_v16  ;;  %v265_v32 = vmul.f32 %v521_v28, %v639_v16  ;;  %v187_v33 = vpop.f32.mrb[3].mxu0  ;;  %v219_v34 = vpop.f32.mrb[3].mxu1 }
  0xf9   :  { %v277_v35 = vadd.f32 %v644_v18, %v254_v25  ;;  %v285_v36 = vadd.f32 %v644_v18, %v262_v26  ;;  %v255_v37 = vmul.f32 %v639_v16, %v187_v33  ;;  %v263_v38 = vmul.f32 %v639_v16, %v219_v34 }
  0xfa   :  { %vm296_vm1 = vcmp.gt.f32.partialorder %v279_v29, 0.0  ;;  %v313_v39 = vmul.f32 %v651_v24, %v279_v29  ;;  %vm304_vm2 = vcmp.gt.f32.partialorder %v287_v30, 0.0  ;;  %v321_v40 = vmul.f32 %v651_v24, %v287_v30 }
  0xfb   :  { %vm294_vm3 = vcmp.gt.f32.partialorder %v277_v35, 0.0  ;;  %v311_v41 = vmul.f32 %v651_v24, %v277_v35  ;;  %vm302_vm4 = vcmp.gt.f32.partialorder %v285_v36, 0.0  ;;  %v319_v42 = vmul.f32 %v651_v24, %v285_v36 }
  0xfc   :  { %v329_v43 = vsel %vm296_vm1, %v279_v29, %v313_v39  ;;  %v337_v44 = vsel %vm304_vm2, %v287_v30, %v321_v40  ;;  %v280_v45 = vadd.f32 %v644_v18, %v257_v31  ;;  %v288_v46 = vadd.f32 %v644_v18, %v265_v32 }
  0xfd   :  { %v464_v47 = vpack.c.bf16 %v329_v43, %v329_v43  ;;  %v472_v48 = vpack.c.bf16 %v337_v44, %v337_v44  ;;  %v327_v49 = vsel %vm294_vm3, %v277_v35, %v311_v41  ;;  %v335_v50 = vsel %vm302_vm4, %v285_v36, %v319_v42  ;;  %v516_v51 = vpop.f32.mrb[4].mxu0  ;;  %v524_v52 = vpop.f32.mrb[4].mxu1 }
  0xfe   :  { %v462_v53 = vpack.c.bf16 %v327_v49, %v327_v49  ;;  %v470_v54 = vpack.c.bf16 %v335_v50, %v335_v50  ;;  %vm297_vm5 = vcmp.gt.f32.partialorder %v280_v45, 0.0  ;;  %v314_v55 = vmul.f32 %v651_v24, %v280_v45  ;;  %v200_v56 = vpop.f32.mrb[5].mxu0  ;;  %v232_v57 = vpop.f32.mrb[5].mxu1 }
  0xff   :  { %410 = vst.msk [vmem:[%s768_s5 + $0x8] sm:$0xf] %vm407_vm0, %v464_v47  ;;  %418 = vst.msk [vmem:[%s768_s5 + $0x28] sm:$0xf] %vm407_vm0, %v472_v48  ;;  %vm305_vm6 = vcmp.gt.f32.partialorder %v288_v46, 0.0  ;;  %v322_v58 = vmul.f32 %v651_v24, %v288_v46  ;;  %v278_v59 = vadd.f32 %v644_v18, %v255_v37  ;;  %v286_v60 = vadd.f32 %v644_v18, %v263_v38  ;;  %v517_v61 = vpop.f32.mrb[6].mxu0 }
 0x100   :  { %v525_v62 = vpop.f32.mrb[6].mxu1  ;;  %408 = vst.msk [vmem:[%s768_s5] sm:$0xf] %vm407_vm0, %v462_v53  ;;  %416 = vst.msk [vmem:[%s768_s5 + $0x20] sm:$0xf] %vm407_vm0, %v470_v54  ;;  %v330_v63 = vsel %vm297_vm5, %v280_v45, %v314_v55  ;;  %v260_v0 = vmul.f32 %v516_v51, %v639_v16  ;;  %v268_v1 = vmul.f32 %v524_v52, %v639_v16  ;;  %v203_v3 = vpop.f32.mrb[7].mxu0 }
 0x101   :  { %v258_v2 = vmul.f32 %v639_v16, %v200_v56  ;;  %v235_v4 = vpop.f32.mrb[7].mxu1  ;;  %v465_v5 = vpack.c.bf16 %v330_v63, %v330_v63  ;;  %v338_v6 = vsel %vm305_vm6, %v288_v46, %v322_v58  ;;  %vm295_vm7 = vcmp.gt.f32.partialorder %v278_v59, 0.0 }
 0x102   :  { %v312_v7 = vmul.f32 %v651_v24, %v278_v59  ;;  %v473_v8 = vpack.c.bf16 %v338_v6, %v338_v6  ;;  %vm303_vm8 = vcmp.gt.f32.partialorder %v286_v60, 0.0  ;;  %v320_v9 = vmul.f32 %v651_v24, %v286_v60 }
 0x103   :  { %v283_v10 = vadd.f32 %v644_v18, %v260_v0  ;;  %411 = vst.msk [vmem:[%s768_s5 + $0xc] sm:$0xf] %vm407_vm0, %v465_v5  ;;  %v291_v12 = vadd.f32 %v644_v18, %v268_v1  ;;  %v281_v13 = vadd.f32 %v644_v18, %v258_v2  ;;  %v266_v14 = vmul.f32 %v639_v16, %v232_v57 }
 0x104   :  { %v328_v11 = vsel %vm295_vm7, %v278_v59, %v312_v7  ;;  %419 = vst.msk [vmem:[%s768_s5 + $0x2c] sm:$0xf] %vm407_vm0, %v473_v8  ;;  %v336_v17 = vsel %vm303_vm8, %v286_v60, %v320_v9  ;;  %v261_v26 = vmul.f32 %v517_v61, %v639_v16  ;;  %v269_v29 = vmul.f32 %v525_v62, %v639_v16 }
 0x105   :  { %v463_v15 = vpack.c.bf16 %v328_v11, %v328_v11  ;;  %vm300_vm9 = vcmp.gt.f32.partialorder %v283_v10, 0.0  ;;  %v317_v19 = vmul.f32 %v651_v24, %v283_v10  ;;  %v471_v20 = vpack.c.bf16 %v336_v17, %v336_v17 }
 0x106   :  { %vm308_vm10 = vcmp.gt.f32.partialorder %v291_v12, 0.0  ;;  %v325_v21 = vmul.f32 %v651_v24, %v291_v12  ;;  %vm298_vm11 = vcmp.gt.f32.partialorder %v281_v13, 0.0  ;;  %v315_v23 = vmul.f32 %v651_v24, %v281_v13 }
 0x107   :  { %409 = vst.msk [vmem:[%s768_s5 + $0x4] sm:$0xf] %vm407_vm0, %v463_v15  ;;  %v333_v22 = vsel %vm300_vm9, %v283_v10, %v317_v19  ;;  %v289_v25 = vadd.f32 %v644_v18, %v266_v14  ;;  %417 = vst.msk [vmem:[%s768_s5 + $0x24] sm:$0xf] %vm407_vm0, %v471_v20  ;;  %v259_v30 = vmul.f32 %v639_v16, %v203_v3 }
 0x108   :  { %v468_v27 = vpack.c.bf16 %v333_v22, %v333_v22  ;;  %v341_v28 = vsel %vm308_vm10, %v291_v12, %v325_v21  ;;  %v331_v32 = vsel %vm298_vm11, %v281_v13, %v315_v23  ;;  %v284_v35 = vadd.f32 %v644_v18, %v261_v26 }
 0x109   :  { %v476_v31 = vpack.c.bf16 %v341_v28, %v341_v28  ;;  %vm306_vm12 = vcmp.gt.f32.partialorder %v289_v25, 0.0  ;;  %v323_v33 = vmul.f32 %v651_v24, %v289_v25  ;;  %v466_v34 = vpack.c.bf16 %v331_v32, %v331_v32 }
 0x10a   :  { %414 = vst.msk [vmem:[%s768_s5 + $0x18] sm:$0xf] %vm407_vm0, %v468_v27  ;;  %v292_v36 = vadd.f32 %v644_v18, %v269_v29  ;;  %v282_v37 = vadd.f32 %v644_v18, %v259_v30  ;;  %v267_v39 = vmul.f32 %v639_v16, %v235_v4  ;;  %vm301_vm13 = vcmp.gt.f32.partialorder %v284_v35, 0.0 }
 0x10b   :  { %422 = vst.msk [vmem:[%s768_s5 + $0x38] sm:$0xf] %vm407_vm0, %v476_v31  ;;  %v339_v38 = vsel %vm306_vm12, %v289_v25, %v323_v33  ;;  %412 = vst.msk [vmem:[%s768_s5 + $0x10] sm:$0xf] %vm407_vm0, %v466_v34  ;;  %v318_v41 = vmul.f32 %v651_v24, %v284_v35 }
 0x10c   :  { %v474_v40 = vpack.c.bf16 %v339_v38, %v339_v38  ;;  %vm309_vm14 = vcmp.gt.f32.partialorder %v292_v36, 0.0  ;;  %v326_v42 = vmul.f32 %v651_v24, %v292_v36  ;;  %vm299_vm15 = vcmp.gt.f32.partialorder %v282_v37, 0.0 }
 0x10d   :  { %v316_v43 = vmul.f32 %v651_v24, %v282_v37  ;;  %v290_v44 = vadd.f32 %v644_v18, %v267_v39  ;;  %v334_v16 = vsel %vm301_vm13, %v284_v35, %v318_v41 }
 0x10e   :  { %420 = vst.msk [vmem:[%s768_s5 + $0x30] sm:$0xf] %vm407_vm0, %v474_v40  ;;  %v469_v45 = vpack.c.bf16 %v334_v16, %v334_v16  ;;  %v342_v46 = vsel %vm309_vm14, %v292_v36, %v326_v42 }
 0x10f   :  { %v332_v47 = vsel %vm299_vm15, %v282_v37, %v316_v43  ;;  %vm307_vm1 = vcmp.gt.f32.partialorder %v290_v44, 0.0  ;;  %v477_v48 = vpack.c.bf16 %v342_v46, %v342_v46  ;;  %v324_v50 = vmul.f32 %v651_v24, %v290_v44 }
 0x110   :  { %v467_v49 = vpack.c.bf16 %v332_v47, %v332_v47  ;;  %415 = vst.msk [vmem:[%s768_s5 + $0x1c] sm:$0xf] %vm407_vm0, %v469_v45 }
 0x111   :  { %423 = vst.msk [vmem:[%s768_s5 + $0x3c] sm:$0xf] %vm407_vm0, %v477_v48  ;;  %v340_v18 = vsel %vm307_vm1, %v290_v44, %v324_v50 }
 0x112   :  { %413 = vst.msk [vmem:[%s768_s5 + $0x14] sm:$0xf] %vm407_vm0, %v467_v49  ;;  %v475_v51 = vpack.c.bf16 %v340_v18, %v340_v18 }
 0x114   :  { %421 = vst.msk [vmem:[%s768_s5 + $0x34] sm:$0xf] %vm407_vm0, %v475_v51 }

// kernel: _lambda_.6
= control target key start
LH: loop header
LB: loop body
LE: loop exit
PB: predicated region body
PF: predicated region fallthrough
CT: control target
= control target key end

     0   :  { %vm476_vm1 = vcmask 257024   ;;  %s810_s1 = inlined_call_operand.vmem [shape: bf16[1,512,32], index: 1, kind: input, shape index: {}]   ;;  %s811_s0 = inlined_call_operand.vmem [shape: bf16[32,512], index: 0, kind: input, shape index: {}]   ;;  %s812_s2 = inlined_call_operand.vmem [shape: f32[1,32], index: 2, kind: input, shape index: {}]   ;;  %s813_s3 = inlined_call_operand.vmem [shape: f32[1,32], index: 3, kind: input, shape index: {}]   ;;  %s814_s4 = inlined_call_operand.<no memory space> [shape: f32[1,1], index: 4, kind: input, shape index: {}]   ;;  %s815_s5 = inlined_call_operand.vmem [shape: bf16[32,32], index: 5, kind: output, shape index: {}]  }
   0x1   :  { %v591_v0 = vld [vmem:[%s810_s1 + $0x40] sm:$0xff]   ;;  %v595_v4 = vld [vmem:[%s810_s1 + $0x48] sm:$0xff]   ;;  %v599_v8 = vld [vmem:[%s810_s1 + $0x50] sm:$0xff]   ;;  %v451_v57 = vstv %s814_s4 }
   0x2   :  { %v592_v1 = vld [vmem:[%s810_s1 + $0xc0] sm:$0xff]   ;;  %535 = vmatprep.subr.bf16.mxu0 %v591_v0  ;;  %v596_v5 = vld [vmem:[%s810_s1 + $0xc8] sm:$0xff]   ;;  %v600_v9 = vld [vmem:[%s810_s1 + $0xd0] sm:$0xff]  }
   0x3   :  { %v593_v2 = vld [vmem:[%s810_s1] sm:$0xff]   ;;  %563 = vmatprep.subr.bf16.mxu1 %v592_v1  ;;  %v597_v6 = vld [vmem:[%s810_s1 + $0x8] sm:$0xff]   ;;  %v601_v10 = vld [vmem:[%s810_s1 + $0x10] sm:$0xff]  }
   0x4   :  { %v594_v3 = vld [vmem:[%s810_s1 + $0x80] sm:$0xff]   ;;  %536 = vmatpush3.bf16.msra.mxu0 %v593_v2  ;;  %v598_v7 = vld [vmem:[%s810_s1 + $0x88] sm:$0xff]   ;;  %v602_v11 = vld [vmem:[%s810_s1 + $0x90] sm:$0xff]  }
   0x5   :  { %564 = vmatpush3.bf16.msra.mxu1 %v594_v3  ;;  %537 = vmatprep.subr.bf16.mxu0 %v595_v4  ;;  %v603_v12 = vld [vmem:[%s810_s1 + $0x58] sm:$0xff]   ;;  %v607_v16 = vld [vmem:[%s810_s1 + $0x60] sm:$0xff]   ;;  %v611_v20 = vld [vmem:[%s810_s1 + $0x68] sm:$0xff]  }
   0x6   :  { %565 = vmatprep.subr.bf16.mxu1 %v596_v5  ;;  %v604_v13 = vld [vmem:[%s810_s1 + $0xd8] sm:$0xff]   ;;  %v608_v17 = vld [vmem:[%s810_s1 + $0xe0] sm:$0xff]   ;;  %v612_v21 = vld [vmem:[%s810_s1 + $0xe8] sm:$0xff]  }
   0x7   :  { %v605_v14 = vld [vmem:[%s810_s1 + $0x18] sm:$0xff]   ;;  %v609_v18 = vld [vmem:[%s810_s1 + $0x20] sm:$0xff]   ;;  %v613_v22 = vld [vmem:[%s810_s1 + $0x28] sm:$0xff]  }
   0x8   :  { %538 = vmatpush3.bf16.msra.mxu0 %v597_v6  ;;  %v606_v15 = vld [vmem:[%s810_s1 + $0x98] sm:$0xff]   ;;  %v610_v19 = vld [vmem:[%s810_s1 + $0xa0] sm:$0xff]   ;;  %v614_v23 = vld [vmem:[%s810_s1 + $0xa8] sm:$0xff]  }
   0x9   :  { %566 = vmatpush3.bf16.msra.mxu1 %v598_v7  ;;  %539 = vmatprep.subr.bf16.mxu0 %v599_v8  ;;  %v615_v24 = vld [vmem:[%s810_s1 + $0x70] sm:$0xff]   ;;  %v619_v28 = vld [vmem:[%s810_s1 + $0x78] sm:$0xff]   ;;  %v525_v49 = vld [vmem:[%s812_s2] ss:$0 sm:$0xff] }
   0xa   :  { %567 = vmatprep.subr.bf16.mxu1 %v600_v9  ;;  %v616_v25 = vld [vmem:[%s810_s1 + $0xf0] sm:$0xff]   ;;  %v620_v29 = vld [vmem:[%s810_s1 + $0xf8] sm:$0xff]   ;;  %v526_v54 = vld [vmem:[%s813_s3] ss:$0 sm:$0xff] }
   0xb   :  { %v617_v26 = vld [vmem:[%s810_s1 + $0x30] sm:$0xff]   ;;  %v621_v30 = vld [vmem:[%s810_s1 + $0x38] sm:$0xff]  }
   0xc   :  { %540 = vmatpush3.bf16.msra.mxu0 %v601_v10  ;;  %v618_v27 = vld [vmem:[%s810_s1 + $0xb0] sm:$0xff]   ;;  %v622_v31 = vld [vmem:[%s810_s1 + $0xb8] sm:$0xff]  }
   0xd   :  { %568 = vmatpush3.bf16.msra.mxu1 %v602_v11  ;;  %541 = vmatprep.subr.bf16.mxu0 %v603_v12  ;;  %v623_v32 = vld [vmem:[%s811_s0] ss:$16 sps:$4 sm:$0xff]   ;;  %v625_v33 = vld [vmem:[%s811_s0 + $0x4] ss:$16 sps:$4 sm:$0xff]   ;;  %v626_v34 = vld [vmem:[%s811_s0 + $0x8] ss:$16 sps:$4 sm:$0xff]  }
   0xe   :  { %569 = vmatprep.subr.bf16.mxu1 %v604_v13  ;;  %v628_v35 = vld [vmem:[%s811_s0 + $0xc] ss:$16 sps:$4 sm:$0xff]   ;;  %358 = vmatprep.mubr.bf16.mxu0 %v625_v33  ;;  %v629_v36 = vld [vmem:[%s811_s0 + $0x24] ss:$16 sps:$4 sm:$0xff]   ;;  %v633_v38 = vld [vmem:[%s811_s0 + $0x20] ss:$16 sps:$4 sm:$0xff]  }
   0xf   :  { %407 = vmatprep.mubr.bf16.mxu1 %v628_v35  ;;  %v631_v37 = vld [vmem:[%s811_s0 + $0x2c] ss:$16 sps:$4 sm:$0xff]   ;;  %v634_v39 = vld [vmem:[%s811_s0 + $0x28] ss:$16 sps:$4 sm:$0xff]  }
  0x10   :  { %542 = vmatpush3.bf16.msra.mxu0 %v605_v14 }
  0x11   :  { %570 = vmatpush3.bf16.msra.mxu1 %v606_v15  ;;  %543 = vmatprep.subr.bf16.mxu0 %v607_v16 }
  0x12   :  { %571 = vmatprep.subr.bf16.mxu1 %v608_v17 }
  0x14   :  { %544 = vmatpush3.bf16.msra.mxu0 %v609_v18 }
  0x15   :  { %572 = vmatpush3.bf16.msra.mxu1 %v610_v19  ;;  %545 = vmatprep.subr.bf16.mxu0 %v611_v20 }
  0x16   :  { %573 = vmatprep.subr.bf16.mxu1 %v612_v21 }
  0x18   :  { %546 = vmatpush3.bf16.msra.mxu0 %v613_v22 }
  0x19   :  { %574 = vmatpush3.bf16.msra.mxu1 %v614_v23  ;;  %547 = vmatprep.subr.bf16.mxu0 %v615_v24 }
  0x1a   :  { %575 = vmatprep.subr.bf16.mxu1 %v616_v25 }
  0x1c   :  { %548 = vmatpush3.bf16.msra.mxu0 %v617_v26 }
  0x1d   :  { %576 = vmatpush3.bf16.msra.mxu1 %v618_v27  ;;  %549 = vmatprep.subr.bf16.mxu0 %v619_v28 }
  0x1e   :  { %577 = vmatprep.subr.bf16.mxu1 %v620_v29 }
  0x20   :  { %550 = vmatpush3.bf16.msra.mxu0 %v621_v30 }
  0x21   :  { %578 = vmatpush3.bf16.msra.mxu1 %v622_v31 }
  0x23   :  { %359 = vmatmul.mubr.bf16.vlgmr.msra.gmra.mrb[0].mxu0 %v623_v32 }
  0x24   :  { %408 = vmatmul.mubr.bf16.vlgmr.msra.gmra.mrb[0].mxu1 %v626_v34  ;;  %366 = vmatprep.mubr.bf16.mxu0 %v629_v36 }
  0x25   :  { %415 = vmatprep.mubr.bf16.mxu1 %v631_v37 }
  0x2b   :  { %367 = vmatmul.mubr.bf16.gmra.mrb[4].mxu0 %v633_v38 }
  0x2c   :  { %416 = vmatmul.mubr.bf16.gmra.mrb[4].mxu1 %v634_v39 }
  0xf6   :  { %v551_v40 = vpop.f32.mrb[0].mxu0 }
  0xf7   :  { %v579_v41 = vpop.f32.mrb[0].mxu1  ;;  %v552_v42 = vpop.f32.mrb[1].mxu0 }
  0xf8   :  { %v553_v43 = vadd.f32 %v552_v42, %v551_v40  ;;  %v580_v44 = vpop.f32.mrb[1].mxu1  ;;  %v554_v45 = vpop.f32.mrb[2].mxu0 }
  0xf9   :  { %v581_v46 = vadd.f32 %v580_v44, %v579_v41  ;;  %v582_v47 = vpop.f32.mrb[2].mxu1  ;;  %v555_v48 = vpop.f32.mrb[3].mxu0 }
  0xfa   :  { %v556_v50 = vadd.f32 %v555_v48, %v554_v45  ;;  %v583_v51 = vpop.f32.mrb[3].mxu1 }
  0xfb   :  { %v410_v52 = vadd.f32 %v581_v46, %v553_v43  ;;  %v584_v53 = vadd.f32 %v583_v51, %v582_v47 }
  0xfd   :  { %v431_v55 = vmul.f32 %v525_v49, %v410_v52  ;;  %v413_v56 = vadd.f32 %v584_v53, %v556_v50 }
  0xfe   :  { %v557_v58 = vpop.f32.mrb[4].mxu0 }
  0xff   :  { %v442_v59 = vadd.f32 %v526_v54, %v431_v55  ;;  %v432_v60 = vmul.f32 %v525_v49, %v413_v56  ;;  %v585_v61 = vpop.f32.mrb[4].mxu1  ;;  %v558_v62 = vpop.f32.mrb[5].mxu0 }
 0x100   :  { %v559_v63 = vadd.f32 %v558_v62, %v557_v58  ;;  %v586_v0 = vpop.f32.mrb[5].mxu1  ;;  %v560_v1 = vpop.f32.mrb[6].mxu0 }
 0x101   :  { %vm447_vm0 = vcmp.gt.f32.partialorder %v442_v59, 0.0  ;;  %v452_v2 = vmul.f32 %v451_v57, %v442_v59  ;;  %v443_v3 = vadd.f32 %v526_v54, %v432_v60  ;;  %v587_v4 = vadd.f32 %v586_v0, %v585_v61  ;;  %v588_v5 = vpop.f32.mrb[6].mxu1  ;;  %v561_v6 = vpop.f32.mrb[7].mxu0 }
 0x102   :  { %v562_v7 = vadd.f32 %v561_v6, %v560_v1  ;;  %v589_v8 = vpop.f32.mrb[7].mxu1 }
 0x103   :  { %v456_v9 = vsel %vm447_vm0, %v442_v59, %v452_v2  ;;  %vm448_vm2 = vcmp.gt.f32.partialorder %v443_v3, 0.0  ;;  %v453_v10 = vmul.f32 %v451_v57, %v443_v3  ;;  %v418_v11 = vadd.f32 %v587_v4, %v559_v63 }
 0x104   :  { %v531_v12 = vpack.c.bf16 %v456_v9, %v456_v9  ;;  %v590_v13 = vadd.f32 %v589_v8, %v588_v5 }
 0x105   :  { %v457_v14 = vsel %vm448_vm2, %v443_v3, %v453_v10  ;;  %v433_v15 = vmul.f32 %v525_v49, %v418_v11 }
 0x106   :  { %477 = vst.msk [vmem:[%s815_s5] sm:$0xf] %vm476_vm1, %v531_v12  ;;  %v532_v16 = vpack.c.bf16 %v457_v14, %v457_v14  ;;  %v421_v17 = vadd.f32 %v590_v13, %v562_v7 }
 0x107   :  { %v444_v18 = vadd.f32 %v526_v54, %v433_v15 }
 0x108   :  { %478 = vst.msk [vmem:[%s815_s5 + $0x4] sm:$0xf] %vm476_vm1, %v532_v16  ;;  %v434_v19 = vmul.f32 %v525_v49, %v421_v17 }
 0x109   :  { %vm449_vm3 = vcmp.gt.f32.partialorder %v444_v18, 0.0  ;;  %v454_v20 = vmul.f32 %v451_v57, %v444_v18 }
 0x10a   :  { %v445_v21 = vadd.f32 %v526_v54, %v434_v19 }
 0x10b   :  { %v458_v22 = vsel %vm449_vm3, %v444_v18, %v454_v20 }
 0x10c   :  { %v533_v23 = vpack.c.bf16 %v458_v22, %v458_v22  ;;  %vm450_vm4 = vcmp.gt.f32.partialorder %v445_v21, 0.0  ;;  %v455_v24 = vmul.f32 %v451_v57, %v445_v21 }
 0x10e   :  { %479 = vst.msk [vmem:[%s815_s5 + $0x8] sm:$0xf] %vm476_vm1, %v533_v23  ;;  %v459_v25 = vsel %vm450_vm4, %v445_v21, %v455_v24 }
 0x10f   :  { %v534_v26 = vpack.c.bf16 %v459_v25, %v459_v25 }
 0x111   :  { %480 = vst.msk [vmem:[%s815_s5 + $0xc] sm:$0xf] %vm476_vm1, %v534_v26 }

// kernel: _lambda_.9
= control target key start
LH: loop header
LB: loop body
LE: loop exit
PB: predicated region body
PF: predicated region fallthrough
CT: control target
= control target key end

     0   :  { %s1473_s20 = smov 0   ;;  %s1772_s0 = inlined_call_operand.vmem [shape: bf16[2,64,160], index: 0, kind: input, shape index: {}]   ;;  %s1773_s1 = inlined_call_operand.vmem [shape: bf16[5,160,64], index: 1, kind: input, shape index: {}]   ;;  %s1774_s2 = inlined_call_operand.vmem [shape: f32[1,64], index: 2, kind: input, shape index: {}]   ;;  %s1775_s3 = inlined_call_operand.vmem [shape: f32[1,64], index: 3, kind: input, shape index: {}]   ;;  %s1776_s4 = inlined_call_operand.<no memory space> [shape: f32[1,1], index: 4, kind: input, shape index: {}]   ;;  %s1777_s5 = inlined_call_operand.vmem [shape: bf16[2,32,64], index: 5, kind: output, shape index: {}]  }
   0x1   :  { %10 = sst [smem:[#allocation2]] %s1776_s4 }
   0x2 LB: > { %s1129_s21 = sadd.s32 4294967295, %s1437_s20   ;;  %p1133_p0 = scmp.ge.s32.totalorder %s1437_s20, 1  ;;  %s1437_s20 = sphi %s1473_s20, %s16_s20  }
   0x3   : > { %p188_p1 = scmp.lt.s32.totalorder %s1437_s20, 3 }
   0x5   : > { %p189_p2 = pnand %p1133_p0, %p188_p1 }
   0x6   : > { %v1367_v0 = vld [vmem:[%s1773_s1 + $0x50] sm:$0xff] (!%p189_p2)   ;;  %v1439_v1 = vmov (!%p189_p2), 0   ;;  %v1368_v2 = vld [vmem:[%s1773_s1 + $0xa0] sm:$0xff] (!%p189_p2)   ;;  %v1369_v3 = vld [vmem:[%s1773_s1 + $0x58] sm:$0xff] (!%p189_p2)   ;;  %p216_p3 = scmp.lt.s32.totalorder (!%p189_p2), %s1129_s21, 1  ;;  %vm351_vm0 = vcmask (!%p189_p2), 261120  }
   0x7   : > { %192 = sbr.rel (%p189_p2) target bundleno = 354 (0x162), region = 40  ;;  %358 = vmatprep.subr.bf16.mxu1 (!%p189_p2), %v1439_v1  ;;  %640 = vmatprep.subr.bf16.mxu0 (!%p189_p2), %v1439_v1  ;;  %v1370_v4 = vld [vmem:[%s1773_s1 + $0xa8] sm:$0xff] (!%p189_p2)   ;;  %v1371_v5 = vld [vmem:[%s1773_s1 + $0x60] sm:$0xff] (!%p189_p2)   ;;  %v1372_v6 = vld [vmem:[%s1773_s1 + $0xb0] sm:$0xff] (!%p189_p2)   ;;  %s1039_s6 = sld [smem:[#allocation2]] (!%p189_p2)  ;;  %vm1069_vm3 = vcmask (!%p189_p2), 519168  }
   0x8   : > { %359 = vmatpush1.bf16.msra.mxu1 (!%p189_p2), %v1367_v0  ;;  %641 = vmatpush1.bf16.msra.mxu0 (!%p189_p2), %v1368_v2  ;;  %v1373_v7 = vld [vmem:[%s1773_s1 + $0x68] sm:$0xff] (!%p189_p2)   ;;  %v1374_v8 = vld [vmem:[%s1773_s1 + $0xb8] sm:$0xff] (!%p189_p2)   ;;  %v1375_v9 = vld [vmem:[%s1773_s1 + $0x70] sm:$0xff] (!%p189_p2)  }
   0x9   : > { %360 = vmatprep.subr.bf16.mxu1 (!%p189_p2), %v1439_v1  ;;  %642 = vmatprep.subr.bf16.mxu0 (!%p189_p2), %v1439_v1  ;;  %v1376_v10 = vld [vmem:[%s1773_s1 + $0xc0] sm:$0xff] (!%p189_p2)   ;;  %v1377_v11 = vld [vmem:[%s1773_s1 + $0x78] sm:$0xff] (!%p189_p2)   ;;  %v1378_v12 = vld [vmem:[%s1773_s1 + $0xc8] sm:$0xff] (!%p189_p2)  }
   0xa   : > { %v1379_v18 = vld [vmem:[%s1773_s1 + $0x80] sm:$0xff] (!%p189_p2)   ;;  %v1380_v19 = vld [vmem:[%s1773_s1 + $0xd0] sm:$0xff] (!%p189_p2)   ;;  %v1381_v20 = vld [vmem:[%s1773_s1 + $0x88] sm:$0xff] (!%p189_p2)  }
   0xb   : > { %v1382_v21 = vld [vmem:[%s1773_s1 + $0xd8] sm:$0xff] (!%p189_p2)   ;;  %v1383_v22 = vld [vmem:[%s1773_s1 + $0x90] sm:$0xff] (!%p189_p2)   ;;  %v1384_v23 = vld [vmem:[%s1773_s1 + $0xe0] sm:$0xff] (!%p189_p2)  }
   0xc   : > { %361 = vmatpush1.bf16.msra.mxu1 (!%p189_p2), %v1369_v3  ;;  %643 = vmatpush1.bf16.msra.mxu0 (!%p189_p2), %v1370_v4  ;;  %v1385_v24 = vld [vmem:[%s1773_s1 + $0x98] sm:$0xff] (!%p189_p2)   ;;  %v1386_v25 = vld [vmem:[%s1773_s1 + $0xe8] sm:$0xff] (!%p189_p2)   ;;  %v1391_v27 = vld [vmem:[%s1773_s1] sm:$0xff] (!%p189_p2)  }
   0xd   : > { %362 = vmatprep.subr.bf16.mxu1 (!%p189_p2), %v1439_v1  ;;  %644 = vmatprep.subr.bf16.mxu0 (!%p189_p2), %v1439_v1  ;;  %v1392_v31 = vld [vmem:[%s1773_s1 + $0xf0] sm:$0xff] (!%p189_p2)   ;;  %v1393_v34 = vld [vmem:[%s1773_s1 + $0x8] sm:$0xff] (!%p189_p2)   ;;  %v1394_v35 = vld [vmem:[%s1773_s1 + $0xf8] sm:$0xff] (!%p189_p2)  }
   0xe   : > { %s1779_s21 = smov (!%p216_p3, %s1129_s21), 1  ;;  %v1395_v38 = vld [vmem:[%s1773_s1 + $0x10] sm:$0xff]   ;;  %v1396_v40 = vld [vmem:[%s1773_s1 + $0x100] sm:$0xff]   ;;  %v1397_v42 = vld [vmem:[%s1773_s1 + $0x18] sm:$0xff]  }
   0xf   : > { %s1306_s14 = sshll.u32 %s1779_s21, 6  ;;  %v1398_v43 = vld [vmem:[%s1773_s1 + $0x108] sm:$0xff]   ;;  %v1399_v44 = vld [vmem:[%s1773_s1 + $0x20] sm:$0xff]   ;;  %v1400_v45 = vld [vmem:[%s1773_s1 + $0x110] sm:$0xff]   ;;  %s1307_s11 = sshll.u32 %s1779_s21, 4 }
  0x10   : > { %363 = vmatpush1.bf16.msra.mxu1 %v1371_v5  ;;  %645 = vmatpush1.bf16.msra.mxu0 %v1372_v6  ;;  %s1527_s19 = scalar_lea.vmem %s1772_s0, %s1306_s14  ;;  %v1401_v46 = vld [vmem:[%s1773_s1 + $0x28] sm:$0xff]   ;;  %v1402_v47 = vld [vmem:[%s1773_s1 + $0x118] sm:$0xff]   ;;  %v1403_v48 = vld [vmem:[%s1773_s1 + $0x30] sm:$0xff]   ;;  %s225_s14 = scalar_lea.vmem %s1777_s5, %s1307_s11 }
  0x11   : > { %364 = vmatprep.subr.bf16.mxu1 %v1439_v1  ;;  %646 = vmatprep.subr.bf16.mxu0 %v1439_v1  ;;  %v1538_v13 = vld [vmem:[%s1527_s19 + $0x8] sm:$0xff]  ;;  %v229_v14 = vld [vmem:[%s1527_s19 + $0x10] sm:$0xff]  ;;  %v532_v15 = vld [vmem:[%s1527_s19 + $0x18] sm:$0xff] }
  0x12   : > { %v1159_v16 = vcombine.high %v1538_v13, %v229_v14  ;;  %v1543_v17 = vcombine.high %v229_v14, %v532_v15  ;;  %v1158_v26 = vcombine.low %v1538_v13, %v229_v14  ;;  %v251_v28 = vld [vmem:[%s1527_s19 + $0x20] sm:$0xff]  ;;  %v1585_v29 = vcombine.low %v229_v14, %v532_v15  ;;  %v1588_v30 = vld [vmem:[%s1527_s19 + $0x28] sm:$0xff]  ;;  %v1405_v50 = vld [vmem:[%s1773_s1 + $0x38] sm:$0xff]  }
  0x13   : > { %v1161_v32 = vcombine.high %v532_v15, %v251_v28  ;;  %v1596_v33 = vcombine.high %v251_v28, %v1588_v30  ;;  %v1610_v36 = vcombine.low %v532_v15, %v251_v28  ;;  %v227_v37 = vld [vmem:[%s1527_s19] sm:$0xff]  ;;  %v1617_v39 = vcombine.low %v251_v28, %v1588_v30  ;;  %v1406_v51 = vld [vmem:[%s1773_s1 + $0x128] sm:$0xff]   ;;  %v1412_v53 = vld [vmem:[%s1773_s1 + $0x130] sm:$0xff]  }
  0x14   : > { %365 = vmatpush1.bf16.msra.mxu1 %v1373_v7  ;;  %647 = vmatpush1.bf16.msra.mxu0 %v1374_v8  ;;  %v1175_v41 = vcombine.high %v227_v37, %v1538_v13  ;;  %v1404_v49 = vld [vmem:[%s1773_s1 + $0x120] sm:$0xff]   ;;  %v1413_v54 = vld [vmem:[%s1773_s1 + $0x48] sm:$0xff]   ;;  %v1414_v55 = vld [vmem:[%s1773_s1 + $0x138] sm:$0xff]   ;;  %v1174_v56 = vcombine.low %v227_v37, %v1538_v13  ;;  %v1044_v37 = vstv %s1039_s6 }
  0x15   : > { %366 = vmatprep.subr.bf16.mxu1 %v1439_v1  ;;  %648 = vmatprep.subr.bf16.mxu0 %v1439_v1  ;;  %v1411_v52 = vld [vmem:[%s1773_s1 + $0x40] sm:$0xff]   ;;  %v1690_v58 = vld [vmem:[%s1527_s19 + $0x30] sm:$0xff]  ;;  %v1418_v60 = vld [vmem:[%s1773_s1 + $0x148] sm:$0xff]  }
  0x16   : > { %1172 = vmatprep.mubr.msk.bf16.mxu1 %vm351_vm0, %v1159_v16  ;;  %1224 = vmatprep.mubr.msk.bf16.mxu0 %vm351_vm0, %v1543_v17  ;;  %v1417_v57 = vld [vmem:[%s1773_s1 + $0x140] sm:$0xff]   ;;  %v1249_v59 = vcombine.high %v1588_v30, %v1690_v58  ;;  %v1248_v61 = vcombine.low %v1588_v30, %v1690_v58  ;;  %v1421_v62 = vld [vmem:[%s1773_s1 + $0x150] sm:$0xff]   ;;  %v858_v63 = vld [vmem:[%s1527_s19 + $0x38] sm:$0xff] }
  0x17   : > { %v1285_v0 = vcombine.high %v1690_v58, %v858_v63  ;;  %v1422_v2 = vld [vmem:[%s1773_s1 + $0x158] sm:$0xff]   ;;  %v1423_v3 = vld [vmem:[%s1773_s1 + $0x160] sm:$0xff]   ;;  %v1424_v4 = vld [vmem:[%s1773_s1 + $0x168] sm:$0xff]  }
  0x18   : > { %367 = vmatpush1.bf16.msra.mxu1 %v1375_v9  ;;  %649 = vmatpush1.bf16.msra.mxu0 %v1376_v10  ;;  %v1425_v5 = vld [vmem:[%s1773_s1 + $0x170] sm:$0xff]   ;;  %v1426_v6 = vld [vmem:[%s1773_s1 + $0x178] sm:$0xff]   ;;  %v1427_v7 = vld [vmem:[%s1773_s1 + $0x180] sm:$0xff]   ;;  %v1284_v9 = vcombine.low %v1690_v58, %v858_v63 }
  0x19   : > { %368 = vmatprep.subr.bf16.mxu1 %v1439_v1  ;;  %650 = vmatprep.subr.bf16.mxu0 %v1439_v1  ;;  %v1428_v8 = vld [vmem:[%s1773_s1 + $0x188] sm:$0xff]  }
  0x1c   : > { %369 = vmatpush1.bf16.msra.mxu1 %v1377_v11  ;;  %651 = vmatpush1.bf16.msra.mxu0 %v1378_v12 }
  0x1d   : > { %370 = vmatprep.subr.bf16.mxu1 %v1439_v1  ;;  %652 = vmatprep.subr.bf16.mxu0 %v1439_v1 }
  0x20   : > { %371 = vmatpush1.bf16.msra.mxu1 %v1379_v18  ;;  %653 = vmatpush1.bf16.msra.mxu0 %v1380_v19 }
  0x21   : > { %372 = vmatprep.subr.bf16.mxu1 %v1439_v1  ;;  %654 = vmatprep.subr.bf16.mxu0 %v1439_v1 }
  0x24   : > { %373 = vmatpush1.bf16.msra.mxu1 %v1381_v20  ;;  %655 = vmatpush1.bf16.msra.mxu0 %v1382_v21 }
  0x25   : > { %374 = vmatprep.subr.bf16.mxu1 %v1439_v1  ;;  %656 = vmatprep.subr.bf16.mxu0 %v1439_v1 }
  0x28   : > { %375 = vmatpush1.bf16.msra.mxu1 %v1383_v22  ;;  %657 = vmatpush1.bf16.msra.mxu0 %v1384_v23  ;;  %v1298_v23 = vld [vmem:[%s1774_s2] ss:$0 sm:$0xff] }
  0x29   : > { %376 = vmatprep.subr.bf16.mxu1 %v1439_v1  ;;  %658 = vmatprep.subr.bf16.mxu0 %v1439_v1 }
  0x2c   : > { %377 = vmatpush1.bf16.msra.mxu1 %v1385_v24  ;;  %659 = vmatpush1.bf16.msra.mxu0 %v1386_v25 }
  0x2d   : > { %482 = vmatprep.subr.bf16.mxu1 %v1439_v1  ;;  %802 = vmatprep.subr.bf16.mxu0 %v1439_v1 }
  0x2f   : > { %391 = vmatmul.mubr.bf16.vlgmr.msra.gmra.mrb[0].mxu1 %v1158_v26  ;;  %673 = vmatmul.mubr.bf16.vlgmr.msra.gmra.mrb[0].mxu0 %v1585_v29 }
  0x30   : > { %483 = vmatpush1.bf16.msra.mxu1 %v1391_v27  ;;  %803 = vmatpush1.bf16.msra.mxu0 %v1392_v31 }
  0x31   : > { %484 = vmatprep.subr.bf16.mxu1 %v1439_v1  ;;  %804 = vmatprep.subr.bf16.mxu0 %v1439_v1 }
  0x32   : > { %1173 = vmatprep.mubr.msk.bf16.mxu1 %vm351_vm0, %v1161_v32  ;;  %1225 = vmatprep.mubr.msk.bf16.mxu0 %vm351_vm0, %v1596_v33 }
  0x34   : > { %485 = vmatpush1.bf16.msra.mxu1 %v1393_v34  ;;  %805 = vmatpush1.bf16.msra.mxu0 %v1394_v35 }
  0x35   : > { %486 = vmatprep.subr.bf16.mxu1 %v1439_v1  ;;  %806 = vmatprep.subr.bf16.mxu0 %v1439_v1 }
  0x37   : > { %399 = vmatmul.mubr.bf16.gmra.mrb[4].mxu1 %v1610_v36  ;;  %681 = vmatmul.mubr.bf16.gmra.mrb[4].mxu0 %v1617_v39 }
  0x38   : > { %487 = vmatpush1.bf16.msra.mxu1 %v1395_v38  ;;  %807 = vmatpush1.bf16.msra.mxu0 %v1396_v40 }
  0x39   : > { %488 = vmatprep.subr.bf16.mxu1 %v1439_v1  ;;  %808 = vmatprep.subr.bf16.mxu0 %v1439_v1 }
  0x3a   : > { %1188 = vmatprep.mubr.msk.bf16.mxu1 %vm351_vm0, %v1175_v41  ;;  %1260 = vmatprep.mubr.msk.bf16.mxu0 %vm351_vm0, %v1161_v32 }
  0x3c   : > { %489 = vmatpush1.bf16.msra.mxu1 %v1397_v42  ;;  %809 = vmatpush1.bf16.msra.mxu0 %v1398_v43 }
  0x3d   : > { %490 = vmatprep.subr.bf16.mxu1 %v1439_v1  ;;  %810 = vmatprep.subr.bf16.mxu0 %v1439_v1 }
  0x40   : > { %491 = vmatpush1.bf16.msra.mxu1 %v1399_v44  ;;  %811 = vmatpush1.bf16.msra.mxu0 %v1400_v45 }
  0x41   : > { %492 = vmatprep.subr.bf16.mxu1 %v1439_v1  ;;  %812 = vmatprep.subr.bf16.mxu0 %v1439_v1 }
  0x44   : > { %493 = vmatpush1.bf16.msra.mxu1 %v1401_v46  ;;  %813 = vmatpush1.bf16.msra.mxu0 %v1402_v47 }
  0x45   : > { %494 = vmatprep.subr.bf16.mxu1 %v1439_v1  ;;  %814 = vmatprep.subr.bf16.mxu0 %v1439_v1 }
  0x48   : > { %495 = vmatpush1.bf16.msra.mxu1 %v1403_v48  ;;  %815 = vmatpush1.bf16.msra.mxu0 %v1404_v49 }
  0x49   : > { %496 = vmatprep.subr.bf16.mxu1 %v1439_v1  ;;  %816 = vmatprep.subr.bf16.mxu0 %v1439_v1 }
  0x4c   : > { %497 = vmatpush1.bf16.msra.mxu1 %v1405_v50  ;;  %817 = vmatpush1.bf16.msra.mxu0 %v1406_v51 }
  0x4d   : > { %498 = vmatprep.subr.bf16.mxu1 %v1439_v1  ;;  %818 = vmatprep.subr.bf16.mxu0 %v1439_v1 }
  0x50   : > { %499 = vmatpush1.bf16.msra.mxu1 %v1411_v52  ;;  %819 = vmatpush1.bf16.msra.mxu0 %v1412_v53 }
  0x51   : > { %500 = vmatprep.subr.bf16.mxu1 %v1439_v1  ;;  %820 = vmatprep.subr.bf16.mxu0 %v1439_v1 }
  0x54   : > { %501 = vmatpush1.bf16.msra.mxu1 %v1413_v54  ;;  %821 = vmatpush1.bf16.msra.mxu0 %v1414_v55 }
  0x55   : > { %1312 = vmatprep.subr.bf16.mxu1 %v1439_v1  ;;  %964 = vmatprep.subr.bf16.mxu0 %v1439_v1 }
  0x57   : > { %515 = vmatmul.mubr.bf16.vlgmr.msra.gmra.mrb[0].mxu1 %v1174_v56  ;;  %835 = vmatmul.mubr.bf16.vlgmr.msra.gmra.mrb[0].mxu0 %v1610_v36 }
  0x58   : > { %1322 = vmatpush1.bf16.msra.mxu1 %v1417_v57  ;;  %965 = vmatpush1.bf16.msra.mxu0 %v1417_v57 }
  0x59   : > { %1313 = vmatprep.subr.bf16.mxu1 %v1439_v1  ;;  %966 = vmatprep.subr.bf16.mxu0 %v1439_v1 }
  0x5a   : > { %1189 = vmatprep.mubr.msk.bf16.mxu1 %vm351_vm0, %v1543_v17  ;;  %1261 = vmatprep.mubr.msk.bf16.mxu0 %vm351_vm0, %v1249_v59 }
  0x5c   : > { %1323 = vmatpush1.bf16.msra.mxu1 %v1418_v60  ;;  %967 = vmatpush1.bf16.msra.mxu0 %v1418_v60 }
  0x5d   : > { %1314 = vmatprep.subr.bf16.mxu1 %v1439_v1  ;;  %968 = vmatprep.subr.bf16.mxu0 %v1439_v1 }
  0x5f   : > { %523 = vmatmul.mubr.bf16.gmra.mrb[4].mxu1 %v1585_v29  ;;  %843 = vmatmul.mubr.bf16.gmra.mrb[4].mxu0 %v1248_v61  ;;  %v1299_v29 = vld [vmem:[%s1775_s3] ss:$0 sm:$0xff] }
  0x60   : > { %1324 = vmatpush1.bf16.msra.mxu1 %v1421_v62  ;;  %969 = vmatpush1.bf16.msra.mxu0 %v1421_v62 }
  0x61   : > { %1315 = vmatprep.subr.bf16.mxu1 %v1439_v1  ;;  %970 = vmatprep.subr.bf16.mxu0 %v1439_v1 }
  0x62   : > { %1296 = vmatprep.mubr.msk.bf16.mxu0 %vm351_vm0, %v1596_v33  ;;  %1297 = vmatprep.mubr.msk.bf16.mxu1 %vm351_vm0, %v1285_v0 }
  0x64   : > { %1325 = vmatpush1.bf16.msra.mxu1 %v1422_v2  ;;  %971 = vmatpush1.bf16.msra.mxu0 %v1422_v2 }
  0x65   : > { %1316 = vmatprep.subr.bf16.mxu1 %v1439_v1  ;;  %972 = vmatprep.subr.bf16.mxu0 %v1439_v1 }
  0x68   : > { %1326 = vmatpush1.bf16.msra.mxu1 %v1423_v3  ;;  %973 = vmatpush1.bf16.msra.mxu0 %v1423_v3 }
  0x69   : > { %1317 = vmatprep.subr.bf16.mxu1 %v1439_v1  ;;  %974 = vmatprep.subr.bf16.mxu0 %v1439_v1 }
  0x6c   : > { %1327 = vmatpush1.bf16.msra.mxu1 %v1424_v4  ;;  %975 = vmatpush1.bf16.msra.mxu0 %v1424_v4 }
  0x6d   : > { %1318 = vmatprep.subr.bf16.mxu1 %v1439_v1  ;;  %976 = vmatprep.subr.bf16.mxu0 %v1439_v1 }
  0x70   : > { %1328 = vmatpush1.bf16.msra.mxu1 %v1425_v5  ;;  %977 = vmatpush1.bf16.msra.mxu0 %v1425_v5 }
  0x71   : > { %1319 = vmatprep.subr.bf16.mxu1 %v1439_v1  ;;  %978 = vmatprep.subr.bf16.mxu0 %v1439_v1 }
  0x74   : > { %1329 = vmatpush1.bf16.msra.mxu1 %v1426_v6  ;;  %979 = vmatpush1.bf16.msra.mxu0 %v1426_v6 }
  0x75   : > { %1320 = vmatprep.subr.bf16.mxu1 %v1439_v1  ;;  %980 = vmatprep.subr.bf16.mxu0 %v1439_v1 }
  0x78   : > { %1330 = vmatpush1.bf16.msra.mxu1 %v1427_v7  ;;  %981 = vmatpush1.bf16.msra.mxu0 %v1427_v7 }
  0x79   : > { %1321 = vmatprep.subr.bf16.mxu1 %v1439_v1  ;;  %982 = vmatprep.subr.bf16.mxu0 %v1439_v1 }
  0x7c   : > { %1331 = vmatpush1.bf16.msra.mxu1 %v1428_v8  ;;  %983 = vmatpush1.bf16.msra.mxu0 %v1428_v8 }
  0x7f   : > { %1005 = vmatmul.mubr.bf16.vlgmr.msra.gmra.mrb[8].mxu1 %v1284_v9  ;;  %997 = vmatmul.mubr.bf16.vlgmr.msra.gmra.mrb[0].mxu0 %v1617_v39 }
 0x12a   : > { %v516_v10 = vpop.f32.mrb[0].mxu1 }
 0x12b   : > { %v518_v11 = vpop.f32.mrb[1].mxu1 }
 0x12c   : > { %v519_v12 = vpop.f32.mrb[2].mxu1 }
 0x12d   : > { %v521_v13 = vpop.f32.mrb[3].mxu1 }
 0x132   : > { %v524_v14 = vpop.f32.mrb[4].mxu1  ;;  %v844_v15 = vpop.f32.mrb[4].mxu0 }
 0x133   : > { %v526_v16 = vpop.f32.mrb[5].mxu1  ;;  %v1334_v17 = vadd.f32 %v844_v15, %v524_v14  ;;  %v846_v18 = vpop.f32.mrb[5].mxu0 }
 0x134   : > { %v527_v19 = vpop.f32.mrb[6].mxu1  ;;  %v847_v20 = vpop.f32.mrb[6].mxu0 }
 0x135   : > { %v529_v21 = vpop.f32.mrb[7].mxu1  ;;  %v1336_v1 = vadd.f32 %v847_v20, %v527_v19  ;;  %v849_v22 = vpop.f32.mrb[7].mxu0 }
 0x152   : > { %v1006_v24 = vpop.f32.mrb[8].mxu1  ;;  %v998_v25 = vpop.f32.mrb[0].mxu0 }
 0x153   : > { %v1335_v26 = vadd.f32 %v1334_v17, %v1006_v24  ;;  %v1008_v27 = vpop.f32.mrb[9].mxu1  ;;  %v1332_v28 = vadd.f32 %v998_v25, %v516_v10  ;;  %v1000_v30 = vpop.f32.mrb[1].mxu0 }
 0x154   : > { %v1009_v31 = vpop.f32.mrb[10].mxu1  ;;  %v1001_v33 = vpop.f32.mrb[2].mxu0 }
 0x155   : > { %v1026_v32 = vmul.f32 %v1335_v26, %v1298_v23  ;;  %v1337_v34 = vadd.f32 %v1336_v1, %v1009_v31  ;;  %v1011_v35 = vpop.f32.mrb[11].mxu1  ;;  %v1024_v36 = vmul.f32 %v1332_v28, %v1298_v23  ;;  %v1333_v38 = vadd.f32 %v1001_v33, %v519_v12  ;;  %v1003_v39 = vpop.f32.mrb[3].mxu0 }
 0x157   : > { %v1037_v40 = vadd.f32 %v1299_v29, %v1026_v32  ;;  %v1027_v41 = vmul.f32 %v1337_v34, %v1298_v23  ;;  %v1035_v42 = vadd.f32 %v1299_v29, %v1024_v36  ;;  %v1025_v43 = vmul.f32 %v1333_v38, %v1298_v23 }
 0x159   : > { %vm1042_vm1 = vcmp.gt.f32.partialorder %v1037_v40, 0.0  ;;  %v1047_v44 = vmul.f32 %v1044_v37, %v1037_v40  ;;  %v1038_v45 = vadd.f32 %v1299_v29, %v1027_v41  ;;  %vm1040_vm2 = vcmp.gt.f32.partialorder %v1035_v42, 0.0 }
 0x15a   : > { %v1045_v46 = vmul.f32 %v1044_v37, %v1035_v42  ;;  %v1036_v47 = vadd.f32 %v1299_v29, %v1025_v43 }
 0x15b   : > { %v1051_v48 = vsel %vm1042_vm1, %v1037_v40, %v1047_v44  ;;  %vm1043_vm4 = vcmp.gt.f32.partialorder %v1038_v45, 0.0  ;;  %v1048_v49 = vmul.f32 %v1044_v37, %v1038_v45 }
 0x15c   : > { %v1049_v50 = vsel %vm1040_vm2, %v1035_v42, %v1045_v46  ;;  %v1310_v51 = vpack.c.bf16 %v1051_v48, %v1051_v48  ;;  %vm1041_vm5 = vcmp.gt.f32.partialorder %v1036_v47, 0.0  ;;  %v1046_v52 = vmul.f32 %v1044_v37, %v1036_v47 }
 0x15d   : > { %v1308_v53 = vpack.c.bf16 %v1049_v50, %v1049_v50  ;;  %v1052_v54 = vsel %vm1043_vm4, %v1038_v45, %v1048_v49 }
 0x15e   : > { %1072 = vst.msk [vmem:[%s225_s14 + $0x8] sm:$0xf] %vm1069_vm3, %v1310_v51  ;;  %v1050_v55 = vsel %vm1041_vm5, %v1036_v47, %v1046_v52  ;;  %v1311_v56 = vpack.c.bf16 %v1052_v54, %v1052_v54 }
 0x15f   : > { %1070 = vst.msk [vmem:[%s225_s14] sm:$0xf] %vm1069_vm3, %v1308_v53  ;;  %v1309_v57 = vpack.c.bf16 %v1050_v55, %v1050_v55 }
 0x160   : > { %1073 = vst.msk [vmem:[%s225_s14 + $0xc] sm:$0xf] %vm1069_vm3, %v1311_v56 }
 0x161   : > { %1071 = vst.msk [vmem:[%s225_s14 + $0x4] sm:$0xf] %vm1069_vm3, %v1309_v57 }
 0x162 PF: > { %s16_s20 = sadd.s32 1, %s1437_s20  }
 0x163   : > { %p13_p4 = scmp.ge.s32.totalorder %s16_s20, 4  }
 0x165   :  { %15 = sbr.rel (!%p13_p4) target bundleno = 2 (0x2), region = 74 }

// kernel: _lambda_.7
= control target key start
LH: loop header
LB: loop body
LE: loop exit
PB: predicated region body
PF: predicated region fallthrough
CT: control target
= control target key end

     0   :  { %s1473_s20 = smov 0   ;;  %s1772_s0 = inlined_call_operand.vmem [shape: bf16[2,64,160], index: 0, kind: input, shape index: {}]   ;;  %s1773_s1 = inlined_call_operand.vmem [shape: bf16[5,160,32], index: 1, kind: input, shape index: {}]   ;;  %s1774_s2 = inlined_call_operand.vmem [shape: f32[1,32], index: 2, kind: input, shape index: {}]   ;;  %s1775_s3 = inlined_call_operand.vmem [shape: f32[1,32], index: 3, kind: input, shape index: {}]   ;;  %s1776_s4 = inlined_call_operand.<no memory space> [shape: f32[1,1], index: 4, kind: input, shape index: {}]   ;;  %s1777_s5 = inlined_call_operand.vmem [shape: bf16[2,32,32], index: 5, kind: output, shape index: {}]  }
   0x1   :  { %10 = sst [smem:[#allocation2]] %s1776_s4 }
   0x2 LB: > { %s1129_s21 = sadd.s32 4294967295, %s1437_s20   ;;  %p1133_p0 = scmp.ge.s32.totalorder %s1437_s20, 1  ;;  %s1437_s20 = sphi %s1473_s20, %s16_s20  }
   0x3   : > { %p188_p1 = scmp.lt.s32.totalorder %s1437_s20, 3 }
   0x5   : > { %p189_p2 = pnand %p1133_p0, %p188_p1 }
   0x6   : > { %v1367_v0 = vld [vmem:[%s1773_s1 + $0x50] sm:$0xff] (!%p189_p2)   ;;  %v1439_v1 = vmov (!%p189_p2), 0   ;;  %v1368_v2 = vld [vmem:[%s1773_s1 + $0xa0] sm:$0xff] (!%p189_p2)   ;;  %v1369_v3 = vld [vmem:[%s1773_s1 + $0x58] sm:$0xff] (!%p189_p2)   ;;  %p216_p3 = scmp.lt.s32.totalorder (!%p189_p2), %s1129_s21, 1  ;;  %vm351_vm0 = vcmask (!%p189_p2), 261120  }
   0x7   : > { %192 = sbr.rel (%p189_p2) target bundleno = 354 (0x162), region = 40  ;;  %358 = vmatprep.subr.bf16.mxu1 (!%p189_p2), %v1439_v1  ;;  %640 = vmatprep.subr.bf16.mxu0 (!%p189_p2), %v1439_v1  ;;  %v1370_v4 = vld [vmem:[%s1773_s1 + $0xa8] sm:$0xff] (!%p189_p2)   ;;  %v1371_v5 = vld [vmem:[%s1773_s1 + $0x60] sm:$0xff] (!%p189_p2)   ;;  %v1372_v6 = vld [vmem:[%s1773_s1 + $0xb0] sm:$0xff] (!%p189_p2)   ;;  %s1039_s6 = sld [smem:[#allocation2]] (!%p189_p2)  ;;  %vm1069_vm3 = vcmask (!%p189_p2), 257024  }
   0x8   : > { %359 = vmatpush1.bf16.msra.mxu1 (!%p189_p2), %v1367_v0  ;;  %641 = vmatpush1.bf16.msra.mxu0 (!%p189_p2), %v1368_v2  ;;  %v1373_v7 = vld [vmem:[%s1773_s1 + $0x68] sm:$0xff] (!%p189_p2)   ;;  %v1374_v8 = vld [vmem:[%s1773_s1 + $0xb8] sm:$0xff] (!%p189_p2)   ;;  %v1375_v9 = vld [vmem:[%s1773_s1 + $0x70] sm:$0xff] (!%p189_p2)  }
   0x9   : > { %360 = vmatprep.subr.bf16.mxu1 (!%p189_p2), %v1439_v1  ;;  %642 = vmatprep.subr.bf16.mxu0 (!%p189_p2), %v1439_v1  ;;  %v1376_v10 = vld [vmem:[%s1773_s1 + $0xc0] sm:$0xff] (!%p189_p2)   ;;  %v1377_v11 = vld [vmem:[%s1773_s1 + $0x78] sm:$0xff] (!%p189_p2)   ;;  %v1378_v12 = vld [vmem:[%s1773_s1 + $0xc8] sm:$0xff] (!%p189_p2)  }
   0xa   : > { %v1379_v18 = vld [vmem:[%s1773_s1 + $0x80] sm:$0xff] (!%p189_p2)   ;;  %v1380_v19 = vld [vmem:[%s1773_s1 + $0xd0] sm:$0xff] (!%p189_p2)   ;;  %v1381_v20 = vld [vmem:[%s1773_s1 + $0x88] sm:$0xff] (!%p189_p2)  }
   0xb   : > { %v1382_v21 = vld [vmem:[%s1773_s1 + $0xd8] sm:$0xff] (!%p189_p2)   ;;  %v1383_v22 = vld [vmem:[%s1773_s1 + $0x90] sm:$0xff] (!%p189_p2)   ;;  %v1384_v23 = vld [vmem:[%s1773_s1 + $0xe0] sm:$0xff] (!%p189_p2)  }
   0xc   : > { %361 = vmatpush1.bf16.msra.mxu1 (!%p189_p2), %v1369_v3  ;;  %643 = vmatpush1.bf16.msra.mxu0 (!%p189_p2), %v1370_v4  ;;  %v1385_v24 = vld [vmem:[%s1773_s1 + $0x98] sm:$0xff] (!%p189_p2)   ;;  %v1386_v25 = vld [vmem:[%s1773_s1 + $0xe8] sm:$0xff] (!%p189_p2)   ;;  %v1391_v27 = vld [vmem:[%s1773_s1] sm:$0xff] (!%p189_p2)  }
   0xd   : > { %362 = vmatprep.subr.bf16.mxu1 (!%p189_p2), %v1439_v1  ;;  %644 = vmatprep.subr.bf16.mxu0 (!%p189_p2), %v1439_v1  ;;  %v1392_v31 = vld [vmem:[%s1773_s1 + $0xf0] sm:$0xff] (!%p189_p2)   ;;  %v1393_v34 = vld [vmem:[%s1773_s1 + $0x8] sm:$0xff] (!%p189_p2)   ;;  %v1394_v35 = vld [vmem:[%s1773_s1 + $0xf8] sm:$0xff] (!%p189_p2)  }
   0xe   : > { %s1779_s21 = smov (!%p216_p3, %s1129_s21), 1  ;;  %v1395_v38 = vld [vmem:[%s1773_s1 + $0x10] sm:$0xff]   ;;  %v1396_v40 = vld [vmem:[%s1773_s1 + $0x100] sm:$0xff]   ;;  %v1397_v42 = vld [vmem:[%s1773_s1 + $0x18] sm:$0xff]  }
   0xf   : > { %s1306_s14 = sshll.u32 %s1779_s21, 6  ;;  %v1398_v43 = vld [vmem:[%s1773_s1 + $0x108] sm:$0xff]   ;;  %v1399_v44 = vld [vmem:[%s1773_s1 + $0x20] sm:$0xff]   ;;  %v1400_v45 = vld [vmem:[%s1773_s1 + $0x110] sm:$0xff]   ;;  %s1307_s11 = sshll.u32 %s1779_s21, 4 }
  0x10   : > { %363 = vmatpush1.bf16.msra.mxu1 %v1371_v5  ;;  %645 = vmatpush1.bf16.msra.mxu0 %v1372_v6  ;;  %s1527_s19 = scalar_lea.vmem %s1772_s0, %s1306_s14  ;;  %v1401_v46 = vld [vmem:[%s1773_s1 + $0x28] sm:$0xff]   ;;  %v1402_v47 = vld [vmem:[%s1773_s1 + $0x118] sm:$0xff]   ;;  %v1403_v48 = vld [vmem:[%s1773_s1 + $0x30] sm:$0xff]   ;;  %s225_s14 = scalar_lea.vmem %s1777_s5, %s1307_s11 }
  0x11   : > { %364 = vmatprep.subr.bf16.mxu1 %v1439_v1  ;;  %646 = vmatprep.subr.bf16.mxu0 %v1439_v1  ;;  %v1538_v13 = vld [vmem:[%s1527_s19 + $0x8] sm:$0xff]  ;;  %v229_v14 = vld [vmem:[%s1527_s19 + $0x10] sm:$0xff]  ;;  %v532_v15 = vld [vmem:[%s1527_s19 + $0x18] sm:$0xff] }
  0x12   : > { %v1159_v16 = vcombine.high %v1538_v13, %v229_v14  ;;  %v1543_v17 = vcombine.high %v229_v14, %v532_v15  ;;  %v1158_v26 = vcombine.low %v1538_v13, %v229_v14  ;;  %v251_v28 = vld [vmem:[%s1527_s19 + $0x20] sm:$0xff]  ;;  %v1585_v29 = vcombine.low %v229_v14, %v532_v15  ;;  %v1588_v30 = vld [vmem:[%s1527_s19 + $0x28] sm:$0xff]  ;;  %v1405_v50 = vld [vmem:[%s1773_s1 + $0x38] sm:$0xff]  }
  0x13   : > { %v1161_v32 = vcombine.high %v532_v15, %v251_v28  ;;  %v1596_v33 = vcombine.high %v251_v28, %v1588_v30  ;;  %v1610_v36 = vcombine.low %v532_v15, %v251_v28  ;;  %v227_v37 = vld [vmem:[%s1527_s19] sm:$0xff]  ;;  %v1617_v39 = vcombine.low %v251_v28, %v1588_v30  ;;  %v1406_v51 = vld [vmem:[%s1773_s1 + $0x128] sm:$0xff]   ;;  %v1412_v53 = vld [vmem:[%s1773_s1 + $0x130] sm:$0xff]  }
  0x14   : > { %365 = vmatpush1.bf16.msra.mxu1 %v1373_v7  ;;  %647 = vmatpush1.bf16.msra.mxu0 %v1374_v8  ;;  %v1175_v41 = vcombine.high %v227_v37, %v1538_v13  ;;  %v1404_v49 = vld [vmem:[%s1773_s1 + $0x120] sm:$0xff]   ;;  %v1413_v54 = vld [vmem:[%s1773_s1 + $0x48] sm:$0xff]   ;;  %v1414_v55 = vld [vmem:[%s1773_s1 + $0x138] sm:$0xff]   ;;  %v1174_v56 = vcombine.low %v227_v37, %v1538_v13  ;;  %v1044_v37 = vstv %s1039_s6 }
  0x15   : > { %366 = vmatprep.subr.bf16.mxu1 %v1439_v1  ;;  %648 = vmatprep.subr.bf16.mxu0 %v1439_v1  ;;  %v1411_v52 = vld [vmem:[%s1773_s1 + $0x40] sm:$0xff]   ;;  %v1690_v58 = vld [vmem:[%s1527_s19 + $0x30] sm:$0xff]  ;;  %v1418_v60 = vld [vmem:[%s1773_s1 + $0x148] sm:$0xff]  }
  0x16   : > { %1172 = vmatprep.mubr.msk.bf16.mxu1 %vm351_vm0, %v1159_v16  ;;  %1224 = vmatprep.mubr.msk.bf16.mxu0 %vm351_vm0, %v1543_v17  ;;  %v1417_v57 = vld [vmem:[%s1773_s1 + $0x140] sm:$0xff]   ;;  %v1249_v59 = vcombine.high %v1588_v30, %v1690_v58  ;;  %v1248_v61 = vcombine.low %v1588_v30, %v1690_v58  ;;  %v1421_v62 = vld [vmem:[%s1773_s1 + $0x150] sm:$0xff]   ;;  %v858_v63 = vld [vmem:[%s1527_s19 + $0x38] sm:$0xff] }
  0x17   : > { %v1285_v0 = vcombine.high %v1690_v58, %v858_v63  ;;  %v1422_v2 = vld [vmem:[%s1773_s1 + $0x158] sm:$0xff]   ;;  %v1423_v3 = vld [vmem:[%s1773_s1 + $0x160] sm:$0xff]   ;;  %v1424_v4 = vld [vmem:[%s1773_s1 + $0x168] sm:$0xff]  }
  0x18   : > { %367 = vmatpush1.bf16.msra.mxu1 %v1375_v9  ;;  %649 = vmatpush1.bf16.msra.mxu0 %v1376_v10  ;;  %v1425_v5 = vld [vmem:[%s1773_s1 + $0x170] sm:$0xff]   ;;  %v1426_v6 = vld [vmem:[%s1773_s1 + $0x178] sm:$0xff]   ;;  %v1427_v7 = vld [vmem:[%s1773_s1 + $0x180] sm:$0xff]   ;;  %v1284_v9 = vcombine.low %v1690_v58, %v858_v63 }
  0x19   : > { %368 = vmatprep.subr.bf16.mxu1 %v1439_v1  ;;  %650 = vmatprep.subr.bf16.mxu0 %v1439_v1  ;;  %v1428_v8 = vld [vmem:[%s1773_s1 + $0x188] sm:$0xff]  }
  0x1c   : > { %369 = vmatpush1.bf16.msra.mxu1 %v1377_v11  ;;  %651 = vmatpush1.bf16.msra.mxu0 %v1378_v12 }
  0x1d   : > { %370 = vmatprep.subr.bf16.mxu1 %v1439_v1  ;;  %652 = vmatprep.subr.bf16.mxu0 %v1439_v1 }
  0x20   : > { %371 = vmatpush1.bf16.msra.mxu1 %v1379_v18  ;;  %653 = vmatpush1.bf16.msra.mxu0 %v1380_v19 }
  0x21   : > { %372 = vmatprep.subr.bf16.mxu1 %v1439_v1  ;;  %654 = vmatprep.subr.bf16.mxu0 %v1439_v1 }
  0x24   : > { %373 = vmatpush1.bf16.msra.mxu1 %v1381_v20  ;;  %655 = vmatpush1.bf16.msra.mxu0 %v1382_v21 }
  0x25   : > { %374 = vmatprep.subr.bf16.mxu1 %v1439_v1  ;;  %656 = vmatprep.subr.bf16.mxu0 %v1439_v1 }
  0x28   : > { %375 = vmatpush1.bf16.msra.mxu1 %v1383_v22  ;;  %657 = vmatpush1.bf16.msra.mxu0 %v1384_v23  ;;  %v1298_v23 = vld [vmem:[%s1774_s2] ss:$0 sm:$0xff] }
  0x29   : > { %376 = vmatprep.subr.bf16.mxu1 %v1439_v1  ;;  %658 = vmatprep.subr.bf16.mxu0 %v1439_v1 }
  0x2c   : > { %377 = vmatpush1.bf16.msra.mxu1 %v1385_v24  ;;  %659 = vmatpush1.bf16.msra.mxu0 %v1386_v25 }
  0x2d   : > { %482 = vmatprep.subr.bf16.mxu1 %v1439_v1  ;;  %802 = vmatprep.subr.bf16.mxu0 %v1439_v1 }
  0x2f   : > { %391 = vmatmul.mubr.bf16.vlgmr.msra.gmra.mrb[0].mxu1 %v1158_v26  ;;  %673 = vmatmul.mubr.bf16.vlgmr.msra.gmra.mrb[0].mxu0 %v1585_v29 }
  0x30   : > { %483 = vmatpush1.bf16.msra.mxu1 %v1391_v27  ;;  %803 = vmatpush1.bf16.msra.mxu0 %v1392_v31 }
  0x31   : > { %484 = vmatprep.subr.bf16.mxu1 %v1439_v1  ;;  %804 = vmatprep.subr.bf16.mxu0 %v1439_v1 }
  0x32   : > { %1173 = vmatprep.mubr.msk.bf16.mxu1 %vm351_vm0, %v1161_v32  ;;  %1225 = vmatprep.mubr.msk.bf16.mxu0 %vm351_vm0, %v1596_v33 }
  0x34   : > { %485 = vmatpush1.bf16.msra.mxu1 %v1393_v34  ;;  %805 = vmatpush1.bf16.msra.mxu0 %v1394_v35 }
  0x35   : > { %486 = vmatprep.subr.bf16.mxu1 %v1439_v1  ;;  %806 = vmatprep.subr.bf16.mxu0 %v1439_v1 }
  0x37   : > { %399 = vmatmul.mubr.bf16.gmra.mrb[4].mxu1 %v1610_v36  ;;  %681 = vmatmul.mubr.bf16.gmra.mrb[4].mxu0 %v1617_v39 }
  0x38   : > { %487 = vmatpush1.bf16.msra.mxu1 %v1395_v38  ;;  %807 = vmatpush1.bf16.msra.mxu0 %v1396_v40 }
  0x39   : > { %488 = vmatprep.subr.bf16.mxu1 %v1439_v1  ;;  %808 = vmatprep.subr.bf16.mxu0 %v1439_v1 }
  0x3a   : > { %1188 = vmatprep.mubr.msk.bf16.mxu1 %vm351_vm0, %v1175_v41  ;;  %1260 = vmatprep.mubr.msk.bf16.mxu0 %vm351_vm0, %v1161_v32 }
  0x3c   : > { %489 = vmatpush1.bf16.msra.mxu1 %v1397_v42  ;;  %809 = vmatpush1.bf16.msra.mxu0 %v1398_v43 }
  0x3d   : > { %490 = vmatprep.subr.bf16.mxu1 %v1439_v1  ;;  %810 = vmatprep.subr.bf16.mxu0 %v1439_v1 }
  0x40   : > { %491 = vmatpush1.bf16.msra.mxu1 %v1399_v44  ;;  %811 = vmatpush1.bf16.msra.mxu0 %v1400_v45 }
  0x41   : > { %492 = vmatprep.subr.bf16.mxu1 %v1439_v1  ;;  %812 = vmatprep.subr.bf16.mxu0 %v1439_v1 }
  0x44   : > { %493 = vmatpush1.bf16.msra.mxu1 %v1401_v46  ;;  %813 = vmatpush1.bf16.msra.mxu0 %v1402_v47 }
  0x45   : > { %494 = vmatprep.subr.bf16.mxu1 %v1439_v1  ;;  %814 = vmatprep.subr.bf16.mxu0 %v1439_v1 }
  0x48   : > { %495 = vmatpush1.bf16.msra.mxu1 %v1403_v48  ;;  %815 = vmatpush1.bf16.msra.mxu0 %v1404_v49 }
  0x49   : > { %496 = vmatprep.subr.bf16.mxu1 %v1439_v1  ;;  %816 = vmatprep.subr.bf16.mxu0 %v1439_v1 }
  0x4c   : > { %497 = vmatpush1.bf16.msra.mxu1 %v1405_v50  ;;  %817 = vmatpush1.bf16.msra.mxu0 %v1406_v51 }
  0x4d   : > { %498 = vmatprep.subr.bf16.mxu1 %v1439_v1  ;;  %818 = vmatprep.subr.bf16.mxu0 %v1439_v1 }
  0x50   : > { %499 = vmatpush1.bf16.msra.mxu1 %v1411_v52  ;;  %819 = vmatpush1.bf16.msra.mxu0 %v1412_v53 }
  0x51   : > { %500 = vmatprep.subr.bf16.mxu1 %v1439_v1  ;;  %820 = vmatprep.subr.bf16.mxu0 %v1439_v1 }
  0x54   : > { %501 = vmatpush1.bf16.msra.mxu1 %v1413_v54  ;;  %821 = vmatpush1.bf16.msra.mxu0 %v1414_v55 }
  0x55   : > { %1312 = vmatprep.subr.bf16.mxu1 %v1439_v1  ;;  %964 = vmatprep.subr.bf16.mxu0 %v1439_v1 }
  0x57   : > { %515 = vmatmul.mubr.bf16.vlgmr.msra.gmra.mrb[0].mxu1 %v1174_v56  ;;  %835 = vmatmul.mubr.bf16.vlgmr.msra.gmra.mrb[0].mxu0 %v1610_v36 }
  0x58   : > { %1322 = vmatpush1.bf16.msra.mxu1 %v1417_v57  ;;  %965 = vmatpush1.bf16.msra.mxu0 %v1417_v57 }
  0x59   : > { %1313 = vmatprep.subr.bf16.mxu1 %v1439_v1  ;;  %966 = vmatprep.subr.bf16.mxu0 %v1439_v1 }
  0x5a   : > { %1189 = vmatprep.mubr.msk.bf16.mxu1 %vm351_vm0, %v1543_v17  ;;  %1261 = vmatprep.mubr.msk.bf16.mxu0 %vm351_vm0, %v1249_v59 }
  0x5c   : > { %1323 = vmatpush1.bf16.msra.mxu1 %v1418_v60  ;;  %967 = vmatpush1.bf16.msra.mxu0 %v1418_v60 }
  0x5d   : > { %1314 = vmatprep.subr.bf16.mxu1 %v1439_v1  ;;  %968 = vmatprep.subr.bf16.mxu0 %v1439_v1 }
  0x5f   : > { %523 = vmatmul.mubr.bf16.gmra.mrb[4].mxu1 %v1585_v29  ;;  %843 = vmatmul.mubr.bf16.gmra.mrb[4].mxu0 %v1248_v61  ;;  %v1299_v29 = vld [vmem:[%s1775_s3] ss:$0 sm:$0xff] }
  0x60   : > { %1324 = vmatpush1.bf16.msra.mxu1 %v1421_v62  ;;  %969 = vmatpush1.bf16.msra.mxu0 %v1421_v62 }
  0x61   : > { %1315 = vmatprep.subr.bf16.mxu1 %v1439_v1  ;;  %970 = vmatprep.subr.bf16.mxu0 %v1439_v1 }
  0x62   : > { %1296 = vmatprep.mubr.msk.bf16.mxu0 %vm351_vm0, %v1596_v33  ;;  %1297 = vmatprep.mubr.msk.bf16.mxu1 %vm351_vm0, %v1285_v0 }
  0x64   : > { %1325 = vmatpush1.bf16.msra.mxu1 %v1422_v2  ;;  %971 = vmatpush1.bf16.msra.mxu0 %v1422_v2 }
  0x65   : > { %1316 = vmatprep.subr.bf16.mxu1 %v1439_v1  ;;  %972 = vmatprep.subr.bf16.mxu0 %v1439_v1 }
  0x68   : > { %1326 = vmatpush1.bf16.msra.mxu1 %v1423_v3  ;;  %973 = vmatpush1.bf16.msra.mxu0 %v1423_v3 }
  0x69   : > { %1317 = vmatprep.subr.bf16.mxu1 %v1439_v1  ;;  %974 = vmatprep.subr.bf16.mxu0 %v1439_v1 }
  0x6c   : > { %1327 = vmatpush1.bf16.msra.mxu1 %v1424_v4  ;;  %975 = vmatpush1.bf16.msra.mxu0 %v1424_v4 }
  0x6d   : > { %1318 = vmatprep.subr.bf16.mxu1 %v1439_v1  ;;  %976 = vmatprep.subr.bf16.mxu0 %v1439_v1 }
  0x70   : > { %1328 = vmatpush1.bf16.msra.mxu1 %v1425_v5  ;;  %977 = vmatpush1.bf16.msra.mxu0 %v1425_v5 }
  0x71   : > { %1319 = vmatprep.subr.bf16.mxu1 %v1439_v1  ;;  %978 = vmatprep.subr.bf16.mxu0 %v1439_v1 }
  0x74   : > { %1329 = vmatpush1.bf16.msra.mxu1 %v1426_v6  ;;  %979 = vmatpush1.bf16.msra.mxu0 %v1426_v6 }
  0x75   : > { %1320 = vmatprep.subr.bf16.mxu1 %v1439_v1  ;;  %980 = vmatprep.subr.bf16.mxu0 %v1439_v1 }
  0x78   : > { %1330 = vmatpush1.bf16.msra.mxu1 %v1427_v7  ;;  %981 = vmatpush1.bf16.msra.mxu0 %v1427_v7 }
  0x79   : > { %1321 = vmatprep.subr.bf16.mxu1 %v1439_v1  ;;  %982 = vmatprep.subr.bf16.mxu0 %v1439_v1 }
  0x7c   : > { %1331 = vmatpush1.bf16.msra.mxu1 %v1428_v8  ;;  %983 = vmatpush1.bf16.msra.mxu0 %v1428_v8 }
  0x7f   : > { %1005 = vmatmul.mubr.bf16.vlgmr.msra.gmra.mrb[8].mxu1 %v1284_v9  ;;  %997 = vmatmul.mubr.bf16.vlgmr.msra.gmra.mrb[0].mxu0 %v1617_v39 }
 0x12a   : > { %v516_v10 = vpop.f32.mrb[0].mxu1 }
 0x12b   : > { %v518_v11 = vpop.f32.mrb[1].mxu1 }
 0x12c   : > { %v519_v12 = vpop.f32.mrb[2].mxu1 }
 0x12d   : > { %v521_v13 = vpop.f32.mrb[3].mxu1 }
 0x132   : > { %v524_v14 = vpop.f32.mrb[4].mxu1  ;;  %v844_v15 = vpop.f32.mrb[4].mxu0 }
 0x133   : > { %v526_v16 = vpop.f32.mrb[5].mxu1  ;;  %v1334_v17 = vadd.f32 %v844_v15, %v524_v14  ;;  %v846_v18 = vpop.f32.mrb[5].mxu0 }
 0x134   : > { %v527_v19 = vpop.f32.mrb[6].mxu1  ;;  %v847_v20 = vpop.f32.mrb[6].mxu0 }
 0x135   : > { %v529_v21 = vpop.f32.mrb[7].mxu1  ;;  %v1336_v1 = vadd.f32 %v847_v20, %v527_v19  ;;  %v849_v22 = vpop.f32.mrb[7].mxu0 }
 0x152   : > { %v1006_v24 = vpop.f32.mrb[8].mxu1  ;;  %v998_v25 = vpop.f32.mrb[0].mxu0 }
 0x153   : > { %v1335_v26 = vadd.f32 %v1334_v17, %v1006_v24  ;;  %v1008_v27 = vpop.f32.mrb[9].mxu1  ;;  %v1332_v28 = vadd.f32 %v998_v25, %v516_v10  ;;  %v1000_v30 = vpop.f32.mrb[1].mxu0 }
 0x154   : > { %v1009_v31 = vpop.f32.mrb[10].mxu1  ;;  %v1001_v33 = vpop.f32.mrb[2].mxu0 }
 0x155   : > { %v1026_v32 = vmul.f32 %v1335_v26, %v1298_v23  ;;  %v1337_v34 = vadd.f32 %v1336_v1, %v1009_v31  ;;  %v1011_v35 = vpop.f32.mrb[11].mxu1  ;;  %v1024_v36 = vmul.f32 %v1332_v28, %v1298_v23  ;;  %v1333_v38 = vadd.f32 %v1001_v33, %v519_v12  ;;  %v1003_v39 = vpop.f32.mrb[3].mxu0 }
 0x157   : > { %v1037_v40 = vadd.f32 %v1299_v29, %v1026_v32  ;;  %v1027_v41 = vmul.f32 %v1337_v34, %v1298_v23  ;;  %v1035_v42 = vadd.f32 %v1299_v29, %v1024_v36  ;;  %v1025_v43 = vmul.f32 %v1333_v38, %v1298_v23 }
 0x159   : > { %vm1042_vm1 = vcmp.gt.f32.partialorder %v1037_v40, 0.0  ;;  %v1047_v44 = vmul.f32 %v1044_v37, %v1037_v40  ;;  %v1038_v45 = vadd.f32 %v1299_v29, %v1027_v41  ;;  %vm1040_vm2 = vcmp.gt.f32.partialorder %v1035_v42, 0.0 }
 0x15a   : > { %v1045_v46 = vmul.f32 %v1044_v37, %v1035_v42  ;;  %v1036_v47 = vadd.f32 %v1299_v29, %v1025_v43 }
 0x15b   : > { %v1051_v48 = vsel %vm1042_vm1, %v1037_v40, %v1047_v44  ;;  %vm1043_vm4 = vcmp.gt.f32.partialorder %v1038_v45, 0.0  ;;  %v1048_v49 = vmul.f32 %v1044_v37, %v1038_v45 }
 0x15c   : > { %v1049_v50 = vsel %vm1040_vm2, %v1035_v42, %v1045_v46  ;;  %v1310_v51 = vpack.c.bf16 %v1051_v48, %v1051_v48  ;;  %vm1041_vm5 = vcmp.gt.f32.partialorder %v1036_v47, 0.0  ;;  %v1046_v52 = vmul.f32 %v1044_v37, %v1036_v47 }
 0x15d   : > { %v1308_v53 = vpack.c.bf16 %v1049_v50, %v1049_v50  ;;  %v1052_v54 = vsel %vm1043_vm4, %v1038_v45, %v1048_v49 }
 0x15e   : > { %1072 = vst.msk [vmem:[%s225_s14 + $0x8] sm:$0xf] %vm1069_vm3, %v1310_v51  ;;  %v1050_v55 = vsel %vm1041_vm5, %v1036_v47, %v1046_v52  ;;  %v1311_v56 = vpack.c.bf16 %v1052_v54, %v1052_v54 }
 0x15f   : > { %1070 = vst.msk [vmem:[%s225_s14] sm:$0xf] %vm1069_vm3, %v1308_v53  ;;  %v1309_v57 = vpack.c.bf16 %v1050_v55, %v1050_v55 }
 0x160   : > { %1073 = vst.msk [vmem:[%s225_s14 + $0xc] sm:$0xf] %vm1069_vm3, %v1311_v56 }
 0x161   : > { %1071 = vst.msk [vmem:[%s225_s14 + $0x4] sm:$0xf] %vm1069_vm3, %v1309_v57 }
 0x162 PF: > { %s16_s20 = sadd.s32 1, %s1437_s20  }
 0x163   : > { %p13_p4 = scmp.ge.s32.totalorder %s16_s20, 4  }
 0x165   :  { %15 = sbr.rel (!%p13_p4) target bundleno = 2 (0x2), region = 74 }

</bundles_post_ra>
